<compile_context>
chip_gen: v5e
topology: v5e:2x2
jax: 0.10.0
libtpu: 0.0.40
codegen_flags: <defaults>
</compile_context>

<pallas_src>
import functools

import jax
import jax.numpy as jnp
from jax import lax
from jax.experimental import pallas as pl
from jax.experimental.pallas import tpu as pltpu


def _round_up(n, m):
    return ((n + m - 1) // m) * m


def _nbytes(a):
    return int(a.size) * a.dtype.itemsize


# ----------------------------------------------------------------------------
# Stage A kernel: encoder MLP (tiled over context rows) + mean aggregate
#                 + fused latent heads + reparam + hz = z @ d1z + db1
# Grid: (B, n_ctx_tiles); batch "parallel", context tiles "arbitrary".
# ----------------------------------------------------------------------------
def encoder_latent_kernel(
    x_ref,                        # (1, tile_nc, x_dim)   bf16
    y_ref,                        # (1, tile_nc, y_dim)   bf16
    eps_ref,                      # (1, 1, z_dim)         f32
    w1x_ref, w1y_ref, b1_ref,     # (x_dim, He) bf16, (y_dim, He) bf16, (1, He) f32
    w2_ref, b2_ref,               # (He, He) bf16, (1, He) f32
    w3_ref, b3_ref,               # (He, r_dim) bf16, (1, r_dim) f32
    wmv_ref, bmv_ref,             # (r_dim, Zpad) f32 fused [wm|wv], (1, Zpad) f32
    d1z_ref, db1_ref,             # (z_dim, Hd) f32, (1, Hd) f32
    zstats_ref,                   # out: (1, 1, Zpad)  [z_mean | z_logvar | pad]
    hz_ref,                       # out: (1, 1, Hd)    z @ d1z + db1
    acc_ref,                      # scratch: (1, r_dim) f32 per-batch r-sum
    *, nc_total, tile_nc,
):
    f32 = jnp.float32
    bf16 = jnp.bfloat16
    t = pl.program_id(1)

    @pl.when(t == 0)
    def _():
        acc_ref[...] = jnp.zeros_like(acc_ref)

    # xy_encoder on this context-row tile (bf16 operands, f32 accumulate)
    x = x_ref[0]                                               # (tile_nc, x_dim)
    y = y_ref[0]                                               # (tile_nc, y_dim)
    h = (jnp.dot(x, w1x_ref[...], preferred_element_type=f32)
         + jnp.dot(y, w1y_ref[...], preferred_element_type=f32)
         + b1_ref[...])
    h = jnp.maximum(h, 0.0)
    h = jnp.dot(h.astype(bf16), w2_ref[...], preferred_element_type=f32) + b2_ref[...]
    h = jnp.maximum(h, 0.0)
    r = jnp.dot(h.astype(bf16), w3_ref[...], preferred_element_type=f32) + b3_ref[...]

    # Mask padded context rows (only compiled in when Nc % tile_nc != 0).
    if nc_total % tile_nc != 0:
        row = t * tile_nc + lax.broadcasted_iota(jnp.int32, (tile_nc, 1), 0)
        r = jnp.where(row < nc_total, r, 0.0)

    acc_ref[...] += jnp.sum(r, axis=0, keepdims=True)          # (1, r_dim)

    # Last context tile of this batch: heads, reparam, z-half of decoder L1.
    @pl.when(t == pl.num_programs(1) - 1)
    def _():
        z_dim = eps_ref.shape[2]
        r_mean = acc_ref[...] * (1.0 / nc_total)                           # (1, r_dim)
        zstats = jnp.dot(r_mean, wmv_ref[...],
                         preferred_element_type=f32) + bmv_ref[...]        # (1, Zpad)
        zstats_ref[0] = zstats
        z_mean = zstats[:, :z_dim]
        z_logvar = zstats[:, z_dim:2 * z_dim]
        z = z_mean + eps_ref[0] * jnp.exp(0.5 * z_logvar)                  # (1, z_dim)
        hz_ref[0] = jnp.dot(z, d1z_ref[...],
                            preferred_element_type=f32) + db1_ref[...]     # (1, Hd)


# ----------------------------------------------------------------------------
# Stage B kernel: decoder MLP, grid over (target tile, batch), both parallel.
# ----------------------------------------------------------------------------
def decoder_kernel(
    hz_ref,                       # (1, 1, Hd) f32  per-batch block: z @ d1z + db1
    x_ref,                        # (1, tile_nt, x_dim) bf16
    d1x_ref,                      # (x_dim, Hd) bf16
    d2_ref, db2_ref,              # (Hd, Hd) bf16, (1, Hd) f32
    d3_ref, db3_ref,              # (Hd, Ypad) bf16 zero-padded, (1, Ypad) f32
    y_ref,                        # out block: (1, tile_nt, Ypad) f32
):
    f32 = jnp.float32
    bf16 = jnp.bfloat16

    x = x_ref[0]                                   # (tile_nt, x_dim)
    hz = hz_ref[0]                                 # (1, Hd) — whole block, no slicing

    h = jnp.dot(x, d1x_ref[...], preferred_element_type=f32) + hz
    h = jnp.maximum(h, 0.0)
    h = jnp.dot(h.astype(bf16), d2_ref[...], preferred_element_type=f32) + db2_ref[...]
    h = jnp.maximum(h, 0.0)
    y_ref[0] = jnp.dot(h.astype(bf16), d3_ref[...],
                       preferred_element_type=f32) + db3_ref[...]


# ----------------------------------------------------------------------------
# Host-side wrapper
# ----------------------------------------------------------------------------
@functools.partial(jax.jit, static_argnames=("y_dim_out",))
def neural_process_forward(prepped, x_ctx, y_ctx, x_tgt, eps, *, y_dim_out):
    B, Nc, x_dim = x_ctx.shape
    _, _, y_dim = y_ctx.shape
    _, Nt, _ = x_tgt.shape
    z_dim = eps.shape[1]
    He = prepped["w2"].shape[0]
    Hd = prepped["d2"].shape[0]
    r_dim = prepped["w3"].shape[1]
    Zpad = prepped["wmv"].shape[1]
    Ypad = prepped["d3p"].shape[1]
    bf16 = jnp.bfloat16

    # ---- Stage A: encoder + aggregate + latent heads + reparam + hz --------
    tile_nc = Nc if Nc <= 1024 else 1024
    Nc_pad = _round_up(Nc, tile_nc)
    x_ctx_b = x_ctx.astype(bf16)
    y_ctx_b = y_ctx.astype(bf16)
    if Nc_pad != Nc:
        x_ctx_b = jnp.pad(x_ctx_b, ((0, 0), (0, Nc_pad - Nc), (0, 0)))
        y_ctx_b = jnp.pad(y_ctx_b, ((0, 0), (0, Nc_pad - Nc), (0, 0)))
    n_ctx_tiles = Nc_pad // tile_nc
    eps3 = eps.reshape(B, 1, z_dim)

    flops_a = (2 * B * Nc_pad * ((x_dim + y_dim) * He + He * He + He * r_dim)
               + 2 * B * (r_dim * Zpad + z_dim * Hd))
    bytes_a = (_nbytes(x_ctx_b) + _nbytes(y_ctx_b) + _nbytes(eps3)
               + sum(_nbytes(prepped[k]) for k in
                     ("w1x", "w1y", "b1", "w2", "b2", "w3", "b3",
                      "wmv", "bmv", "d1z", "db1"))
               + B * (Zpad + Hd) * 4)

    kernel_a = functools.partial(encoder_latent_kernel,
                                 nc_total=Nc, tile_nc=tile_nc)
    const2 = lambda b, t: (0, 0)

    zstats, hz = pl.pallas_call(
        kernel_a,
        out_shape=(
            jax.ShapeDtypeStruct((B, 1, Zpad), jnp.float32),
            jax.ShapeDtypeStruct((B, 1, Hd), jnp.float32),
        ),
        grid=(B, n_ctx_tiles),
        in_specs=[
            pl.BlockSpec((1, tile_nc, x_dim), lambda b, t: (b, t, 0)),   # x ctx tile
            pl.BlockSpec((1, tile_nc, y_dim), lambda b, t: (b, t, 0)),   # y ctx tile
            pl.BlockSpec((1, 1, z_dim), lambda b, t: (b, 0, 0)),         # eps (per b)
            pl.BlockSpec((x_dim, He), const2),                           # w1x
            pl.BlockSpec((y_dim, He), const2),                           # w1y
            pl.BlockSpec((1, He), const2),                               # b1
            pl.BlockSpec((He, He), const2),                              # w2
            pl.BlockSpec((1, He), const2),                               # b2
            pl.BlockSpec((He, r_dim), const2),                           # w3
            pl.BlockSpec((1, r_dim), const2),                            # b3
            pl.BlockSpec((r_dim, Zpad), const2),                         # wmv
            pl.BlockSpec((1, Zpad), const2),                             # bmv
            pl.BlockSpec((z_dim, Hd), const2),                           # d1z
            pl.BlockSpec((1, Hd), const2),                               # db1
        ],
        out_specs=(
            pl.BlockSpec((1, 1, Zpad), lambda b, t: (b, 0, 0)),
            pl.BlockSpec((1, 1, Hd), lambda b, t: (b, 0, 0)),
        ),
        scratch_shapes=[pltpu.VMEM((1, r_dim), jnp.float32)],
        compiler_params=pltpu.CompilerParams(
            dimension_semantics=("parallel", "arbitrary")),
        cost_estimate=pl.CostEstimate(
            flops=int(flops_a), transcendentals=int(B * z_dim),
            bytes_accessed=int(bytes_a)),
    )(
        x_ctx_b, y_ctx_b, eps3,
        prepped["w1x"], prepped["w1y"], prepped["b1"],
        prepped["w2"], prepped["b2"],
        prepped["w3"], prepped["b3"],
        prepped["wmv"], prepped["bmv"],
        prepped["d1z"], prepped["db1"],
    )

    z_mean = zstats[:, 0, :z_dim]
    z_logvar = zstats[:, 0, z_dim:2 * z_dim]

    # ---- Stage B: decoder, grid over (target tiles, batch) -----------------
    tile_nt = 512 if Nt >= 512 else _round_up(Nt, 8)
    Nt_pad = _round_up(Nt, tile_nt)
    x_tgt_b = x_tgt.astype(bf16)
    if Nt_pad != Nt:
        x_tgt_b = jnp.pad(x_tgt_b, ((0, 0), (0, Nt_pad - Nt), (0, 0)))
    n_tiles = Nt_pad // tile_nt

    flops_b = 2 * B * Nt_pad * (x_dim * Hd + Hd * Hd + Hd * Ypad)
    bytes_b = (_nbytes(x_tgt_b) + B * Hd * 4
               + sum(_nbytes(prepped[k]) for k in
                     ("d1x", "d2", "db2", "d3p", "db3p"))
               + B * Nt_pad * Ypad * 4)

    constw = lambda t, b: (0, 0)

    y_pad = pl.pallas_call(
        decoder_kernel,
        out_shape=jax.ShapeDtypeStruct((B, Nt_pad, Ypad), jnp.float32),
        grid=(n_tiles, B),      # long tile axis first → balanced megacore split (v7x)
        in_specs=[
            pl.BlockSpec((1, 1, Hd), lambda t, b: (b, 0, 0)),            # hz per batch
            pl.BlockSpec((1, tile_nt, x_dim), lambda t, b: (b, t, 0)),   # x target tile
            pl.BlockSpec((x_dim, Hd), constw),                           # d1x
            pl.BlockSpec((Hd, Hd), constw),                              # d2
            pl.BlockSpec((1, Hd), constw),                               # db2
            pl.BlockSpec((Hd, Ypad), constw),                            # d3 (padded)
            pl.BlockSpec((1, Ypad), constw),                             # db3 (padded)
        ],
        out_specs=pl.BlockSpec((1, tile_nt, Ypad), lambda t, b: (b, t, 0)),
        compiler_params=pltpu.CompilerParams(
            dimension_semantics=("parallel", "parallel")),
        cost_estimate=pl.CostEstimate(
            flops=int(flops_b), transcendentals=0,
            bytes_accessed=int(bytes_b)),
    )(hz, x_tgt_b, prepped["d1x"], prepped["d2"], prepped["db2"],
      prepped["d3p"], prepped["db3p"])

    y_logits = y_pad[:, :Nt, :y_dim_out]
    return y_logits, z_mean, z_logvar


# ----------------------------------------------------------------------------
# Parameter construction (torch-equivalent, Linear stored as (in, out))
# ----------------------------------------------------------------------------
def init_params(key, x_dim, y_dim_onehot, r_dim, z_dim,
                enc_hidden_dim, dec_hidden_dim, y_dim_out, num_all_tasks):
    def lin(k, din, dout, scale=0.05):
        kw, kb = jax.random.split(k)
        return (scale * jax.random.normal(kw, (din, dout), jnp.float32),
                scale * jax.random.normal(kb, (1, dout), jnp.float32))

    ks = jax.random.split(key, 9)
    w1, b1 = lin(ks[0], x_dim + y_dim_onehot, enc_hidden_dim)
    w2, b2 = lin(ks[1], enc_hidden_dim, enc_hidden_dim)
    w3, b3 = lin(ks[2], enc_hidden_dim, r_dim)
    wm, bm = lin(ks[3], r_dim, z_dim)
    wv, bv = lin(ks[4], r_dim, z_dim)
    d1, db1 = lin(ks[5], z_dim + x_dim, dec_hidden_dim)
    d2, db2 = lin(ks[6], dec_hidden_dim, dec_hidden_dim)
    d3, db3 = lin(ks[7], dec_hidden_dim, y_dim_out)

    return dict(
        w1=w1, b1=b1, w2=w2, b2=b2, w3=w3, b3=b3,
        wm=wm, bm=bm, wv=wv, bv=bv,
        d1=d1, db1=db1, d2=d2, db2=db2, d3=d3, db3=db3,
        # Present in the module, not consumed by forward():
        task_prior_means=0.1 * jax.random.normal(ks[8], (num_all_tasks, z_dim),
                                                 jnp.float32),
        task_prior_logvars=jnp.zeros((num_all_tasks, z_dim), jnp.float32),
    )


def prepare_params(p, x_dim, z_dim):
    """Split w1/d1, fuse latent heads, lane-pad d3, bf16-cast streamed weights."""
    bf16 = jnp.bfloat16
    r_dim = p["wm"].shape[0]
    dec_h = p["d2"].shape[0]
    y_out = p["d3"].shape[1]
    Zpad = _round_up(2 * z_dim, 128)
    Ypad = _round_up(y_out, 128)

    wmv = jnp.zeros((r_dim, Zpad), jnp.float32)
    wmv = wmv.at[:, :z_dim].set(p["wm"]).at[:, z_dim:2 * z_dim].set(p["wv"])
    bmv = jnp.zeros((1, Zpad), jnp.float32)
    bmv = bmv.at[:, :z_dim].set(p["bm"]).at[:, z_dim:2 * z_dim].set(p["bv"])

    d3p = jnp.zeros((dec_h, Ypad), jnp.float32).at[:, :y_out].set(p["d3"])
    db3p = jnp.zeros((1, Ypad), jnp.float32).at[:, :y_out].set(p["db3"])

    return dict(
        # encoder: bf16 streamed weights, f32 biases (accumulation stays f32)
        w1x=p["w1"][:x_dim].astype(bf16), w1y=p["w1"][x_dim:].astype(bf16),
        b1=p["b1"],
        w2=p["w2"].astype(bf16), b2=p["b2"],
        w3=p["w3"].astype(bf16), b3=p["b3"],
        # latent heads + z-half of decoder layer 1 stay f32 (tiny, accuracy path)
        wmv=wmv, bmv=bmv,
        d1z=p["d1"][:z_dim], db1=p["db1"],
        # decoder: bf16 weights, f32 biases; d3 lane-padded to 128
        d1x=p["d1"][z_dim:].astype(bf16),
        d2=p["d2"].astype(bf16), db2=p["db2"],
        d3p=d3p.astype(bf16), db3p=db3p,
    )


# ----------------------------------------------------------------------------
# References
# ----------------------------------------------------------------------------
def reference_forward(p, x_ctx, y_ctx, x_tgt, eps):
    """Full-f32 reference with the original module structure (concat etc.)."""
    xy = jnp.concatenate([x_ctx, y_ctx], axis=-1)
    h = jnp.maximum(xy @ p["w1"] + p["b1"], 0.0)
    h = jnp.maximum(h @ p["w2"] + p["b2"], 0.0)
    r_i = h @ p["w3"] + p["b3"]
    r_agg = jnp.mean(r_i, axis=1)
    z_mean = r_agg @ p["wm"] + p["bm"]
    z_logvar = r_agg @ p["wv"] + p["bv"]
    z = z_mean + eps * jnp.exp(0.5 * z_logvar)
    B, Nt, _ = x_tgt.shape
    z_rep = jnp.broadcast_to(z[:, None, :], (B, Nt, z.shape[-1]))
    zx = jnp.concatenate([z_rep, x_tgt], axis=-1)
    hd = jnp.maximum(zx @ p["d1"] + p["db1"], 0.0)
    hd = jnp.maximum(hd @ p["d2"] + p["db2"], 0.0)
    return hd @ p["d3"] + p["db3"], z_mean, z_logvar


def reference_matched(pp, x_ctx, y_ctx, x_tgt, eps, z_dim, y_out):
    """Pure-JAX reference using the same bf16 cast points as the kernels."""
    bf = jnp.bfloat16
    f32 = jnp.float32
    dot = lambda a, b: jnp.dot(a, b, preferred_element_type=f32)
    xb, yb, xtb = x_ctx.astype(bf), y_ctx.astype(bf), x_tgt.astype(bf)
    h = jnp.maximum(dot(xb, pp["w1x"]) + dot(yb, pp["w1y"]) + pp["b1"], 0.0)
    h = jnp.maximum(dot(h.astype(bf), pp["w2"]) + pp["b2"], 0.0)
    r = dot(h.astype(bf), pp["w3"]) + pp["b3"]
    r_mean = jnp.mean(r, axis=1)
    zst = r_mean @ pp["wmv"] + pp["bmv"]
    zm, zv = zst[:, :z_dim], zst[:, z_dim:2 * z_dim]
    z = zm + eps * jnp.exp(0.5 * zv)
    hz = z @ pp["d1z"] + pp["db1"]
    h = jnp.maximum(dot(xtb, pp["d1x"]) + hz[:, None, :], 0.0)
    h = jnp.maximum(dot(h.astype(bf), pp["d2"]) + pp["db2"], 0.0)
    y = dot(h.astype(bf), pp["d3p"]) + pp["db3p"]
    return y[..., :y_out], zm, zv


if __name__ == "__main__":
    # Small shapes, consistent with the module defaults.
    B, N_CTX, N_TGT = 2, 8, 8
    X_DIM, Y_DIM_ONEHOT = 784, 10
    R_DIM, Z_DIM = 128, 64
    ENC_H, DEC_H, Y_OUT = 128, 128, 10
    NUM_TASKS = 5

    key = jax.random.PRNGKey(0)
    kp, kx, ky, kt, ke = jax.random.split(key, 5)

    raw = init_params(kp, X_DIM, Y_DIM_ONEHOT, R_DIM, Z_DIM,
                      ENC_H, DEC_H, Y_OUT, NUM_TASKS)
    prepped = prepare_params(raw, X_DIM, Z_DIM)

    x_context = jax.random.normal(kx, (B, N_CTX, X_DIM), jnp.float32)
    y_context_onehot = jax.nn.one_hot(
        jax.random.randint(ky, (B, N_CTX), 0, Y_DIM_ONEHOT), Y_DIM_ONEHOT,
        dtype=jnp.float32)
    x_target = jax.random.normal(kt, (B, N_TGT, X_DIM), jnp.float32)
    # eps for reparameterization (torch.randn_like equivalent, passed in)
    eps = jax.random.normal(ke, (B, Z_DIM), jnp.float32)

    y_logits, z_mean, z_logvar = neural_process_forward(
        prepped, x_context, y_context_onehot, x_target, eps, y_dim_out=Y_OUT)
    jax.block_until_ready((y_logits, z_mean, z_logvar))

    assert y_logits.shape == (B, N_TGT, Y_OUT)
    assert z_mean.shape == (B, Z_DIM) and z_logvar.shape == (B, Z_DIM)

    # Tight check vs. a pure-JAX reference with identical bf16 cast points.
    y_m, zm_m, zv_m = reference_matched(
        prepped, x_context, y_context_onehot, x_target, eps, Z_DIM, Y_OUT)
    assert jnp.allclose(y_logits, y_m, atol=5e-3, rtol=5e-3)
    assert jnp.allclose(z_mean, zm_m, atol=5e-3, rtol=5e-3)
    assert jnp.allclose(z_logvar, zv_m, atol=5e-3, rtol=5e-3)

    # Looser check vs. the full-f32 module-semantics reference (bf16 rounding).
    y_ref, zm_ref, zv_ref = reference_forward(
        raw, x_context, y_context_onehot, x_target, eps)
    assert jnp.allclose(y_logits, y_ref, atol=5e-2, rtol=5e-2)
    assert jnp.allclose(z_mean, zm_ref, atol=5e-2, rtol=5e-2)
    assert jnp.allclose(z_logvar, zv_ref, atol=5e-2, rtol=5e-2)

    print("KERNEL_OK")
</pallas_src>

<mosaic_0001>
module attributes {stable_mosaic.version = 11 : i64} {
  func.func @encoder_latent_kernel(%arg0: i32, %arg1: i32, %arg2: memref<1x8x784xbf16, #tpu.memory_space<vmem>>, %arg3: memref<1x8x10xbf16, #tpu.memory_space<vmem>>, %arg4: memref<1x1x64xf32, #tpu.memory_space<vmem>>, %arg5: memref<784x128xbf16, #tpu.memory_space<vmem>>, %arg6: memref<10x128xbf16, #tpu.memory_space<vmem>>, %arg7: memref<1x128xf32, #tpu.memory_space<vmem>>, %arg8: memref<128x128xbf16, #tpu.memory_space<vmem>>, %arg9: memref<1x128xf32, #tpu.memory_space<vmem>>, %arg10: memref<128x128xbf16, #tpu.memory_space<vmem>>, %arg11: memref<1x128xf32, #tpu.memory_space<vmem>>, %arg12: memref<128x128xf32, #tpu.memory_space<vmem>>, %arg13: memref<1x128xf32, #tpu.memory_space<vmem>>, %arg14: memref<64x128xf32, #tpu.memory_space<vmem>>, %arg15: memref<1x128xf32, #tpu.memory_space<vmem>>, %arg16: memref<1x1x128xf32, #tpu.memory_space<vmem>>, %arg17: memref<1x1x128xf32, #tpu.memory_space<vmem>>, %arg18: memref<1x128xf32, #tpu.memory_space<vmem>>) attributes {dimension_semantics = [#tpu.dimension_semantics<parallel>, #tpu.dimension_semantics<arbitrary>], iteration_bounds = array<i64: 2, 1>, scalar_prefetch = 0 : i64, scratch_operands = 1 : i64, tpu.core_type = #tpu.core_type<tc>, window_params = [{transform_indices = @transform_0, window_bounds = array<i64: 1, 8, 784>}, {transform_indices = @transform_1, window_bounds = array<i64: 1, 8, 10>}, {transform_indices = @transform_2, window_bounds = array<i64: 1, 1, 64>}, {pipeline_mode = #tpu.pipeline_mode<synchronous>, transform_indices = @transform_3, window_bounds = array<i64: 784, 128>}, {pipeline_mode = #tpu.pipeline_mode<synchronous>, transform_indices = @transform_4, window_bounds = array<i64: 10, 128>}, {pipeline_mode = #tpu.pipeline_mode<synchronous>, transform_indices = @transform_5, window_bounds = array<i64: 1, 128>}, {pipeline_mode = #tpu.pipeline_mode<synchronous>, transform_indices = @transform_6, window_bounds = array<i64: 128, 128>}, {pipeline_mode = #tpu.pipeline_mode<synchronous>, transform_indices = @transform_7, window_bounds = array<i64: 1, 128>}, {pipeline_mode = #tpu.pipeline_mode<synchronous>, transform_indices = @transform_8, window_bounds = array<i64: 128, 128>}, {pipeline_mode = #tpu.pipeline_mode<synchronous>, transform_indices = @transform_9, window_bounds = array<i64: 1, 128>}, {pipeline_mode = #tpu.pipeline_mode<synchronous>, transform_indices = @transform_10, window_bounds = array<i64: 128, 128>}, {pipeline_mode = #tpu.pipeline_mode<synchronous>, transform_indices = @transform_11, window_bounds = array<i64: 1, 128>}, {pipeline_mode = #tpu.pipeline_mode<synchronous>, transform_indices = @transform_12, window_bounds = array<i64: 64, 128>}, {pipeline_mode = #tpu.pipeline_mode<synchronous>, transform_indices = @transform_13, window_bounds = array<i64: 1, 128>}, {transform_indices = @transform_14, window_bounds = array<i64: 1, 1, 128>}, {transform_indices = @transform_15, window_bounds = array<i64: 1, 1, 128>}]} {
    %c0_i32 = arith.constant 0 : i32
    %0 = arith.cmpi eq, %arg1, %c0_i32 : i32
    %1 = arith.extui %0 : i1 to i32
    %c0_i32_0 = arith.constant 0 : i32
    %2 = arith.cmpi ne, %1, %c0_i32_0 : i32
    scf.if %2 {
      %cst_32 = arith.constant 0.000000e+00 : f32
      %39 = vector.broadcast %cst_32 : f32 to vector<1x128xf32>
      %c0_33 = arith.constant 0 : index
      %c0_34 = arith.constant 0 : index
      %40 = vector.load %arg18[%c0_33, %c0_34] : memref<1x128xf32, #tpu.memory_space<vmem>>, vector<1x128xf32>
      tpu.vector_store %arg18[%c0_33, %c0_34], %39 {strides = array<i32>} : memref<1x128xf32, #tpu.memory_space<vmem>>, vector<1x128xf32>,
    } else {
    }
    %c0 = arith.constant 0 : index
    %c0_1 = arith.constant 0 : index
    %c0_2 = arith.constant 0 : index
    %3 = vector.load %arg2[%c0, %c0_1, %c0_2] : memref<1x8x784xbf16, #tpu.memory_space<vmem>>, vector<1x8x784xbf16>
    %4 = vector.shape_cast %3 : vector<1x8x784xbf16> to vector<8x784xbf16>
    %c0_3 = arith.constant 0 : index
    %c0_4 = arith.constant 0 : index
    %c0_5 = arith.constant 0 : index
    %5 = vector.load %arg3[%c0_3, %c0_4, %c0_5] : memref<1x8x10xbf16, #tpu.memory_space<vmem>>, vector<1x8x10xbf16>
    %6 = vector.shape_cast %5 : vector<1x8x10xbf16> to vector<8x10xbf16>
    %c0_6 = arith.constant 0 : index
    %c0_7 = arith.constant 0 : index
    %7 = vector.load %arg5[%c0_6, %c0_7] : memref<784x128xbf16, #tpu.memory_space<vmem>>, vector<784x128xbf16>
    %cst = arith.constant dense<0.000000e+00> : vector<8x128xf32>
    %8 = tpu.matmul %4, %7, %cst {dimension_numbers = #tpu.dot_dimension_numbers<[1], [0], [0], [1], [0, 0, 1, 1], [], []>} : vector<8x784xbf16>, vector<784x128xbf16>, vector<8x128xf32> -> vector<8x128xf32>
    %c0_8 = arith.constant 0 : index
    %c0_9 = arith.constant 0 : index
    %9 = vector.load %arg6[%c0_8, %c0_9] : memref<10x128xbf16, #tpu.memory_space<vmem>>, vector<10x128xbf16>
    %cst_10 = arith.constant dense<0.000000e+00> : vector<8x128xf32>
    %10 = tpu.matmul %6, %9, %cst_10 {dimension_numbers = #tpu.dot_dimension_numbers<[1], [0], [0], [1], [0, 0, 1, 1], [], []>} : vector<8x10xbf16>, vector<10x128xbf16>, vector<8x128xf32> -> vector<8x128xf32>
    %11 = arith.addf %8, %10 : vector<8x128xf32>
    %c0_11 = arith.constant 0 : index
    %c0_12 = arith.constant 0 : index
    %12 = vector.load %arg7[%c0_11, %c0_12] : memref<1x128xf32, #tpu.memory_space<vmem>>, vector<1x128xf32>
    %13 = vector.broadcast %12 : vector<1x128xf32> to vector<8x128xf32>
    %14 = arith.addf %11, %13 : vector<8x128xf32>
    %cst_13 = arith.constant 0.000000e+00 : f32
    %15 = vector.broadcast %cst_13 : f32 to vector<8x128xf32>
    %16 = arith.maximumf %14, %15 : vector<8x128xf32>
    %17 = arith.truncf %16 : vector<8x128xf32> to vector<8x128xbf16>
    %c0_14 = arith.constant 0 : index
    %c0_15 = arith.constant 0 : index
    %18 = vector.load %arg8[%c0_14, %c0_15] : memref<128x128xbf16, #tpu.memory_space<vmem>>, vector<128x128xbf16>
    %cst_16 = arith.constant dense<0.000000e+00> : vector<8x128xf32>
    %19 = tpu.matmul %17, %18, %cst_16 {dimension_numbers = #tpu.dot_dimension_numbers<[1], [0], [0], [1], [0, 0, 1, 1], [], []>} : vector<8x128xbf16>, vector<128x128xbf16>, vector<8x128xf32> -> vector<8x128xf32>
    %c0_17 = arith.constant 0 : index
    %c0_18 = arith.constant 0 : index
    %20 = vector.load %arg9[%c0_17, %c0_18] : memref<1x128xf32, #tpu.memory_space<vmem>>, vector<1x128xf32>
    %21 = vector.broadcast %20 : vector<1x128xf32> to vector<8x128xf32>
    %22 = arith.addf %19, %21 : vector<8x128xf32>
    %cst_19 = arith.constant 0.000000e+00 : f32
    %23 = vector.broadcast %cst_19 : f32 to vector<8x128xf32>
    %24 = arith.maximumf %22, %23 : vector<8x128xf32>
    %25 = arith.truncf %24 : vector<8x128xf32> to vector<8x128xbf16>
    %c0_20 = arith.constant 0 : index
    %c0_21 = arith.constant 0 : index
    %26 = vector.load %arg10[%c0_20, %c0_21] : memref<128x128xbf16, #tpu.memory_space<vmem>>, vector<128x128xbf16>
    %cst_22 = arith.constant dense<0.000000e+00> : vector<8x128xf32>
    %27 = tpu.matmul %25, %26, %cst_22 {dimension_numbers = #tpu.dot_dimension_numbers<[1], [0], [0], [1], [0, 0, 1, 1], [], []>} : vector<8x128xbf16>, vector<128x128xbf16>, vector<8x128xf32> -> vector<8x128xf32>
    %c0_23 = arith.constant 0 : index
    %c0_24 = arith.constant 0 : index
    %28 = vector.load %arg11[%c0_23, %c0_24] : memref<1x128xf32, #tpu.memory_space<vmem>>, vector<1x128xf32>
    %29 = vector.broadcast %28 : vector<1x128xf32> to vector<8x128xf32>
    %30 = arith.addf %27, %29 : vector<8x128xf32>
    %c0_25 = arith.constant 0 : index
    %c0_26 = arith.constant 0 : index
    %31 = vector.load %arg18[%c0_25, %c0_26] : memref<1x128xf32, #tpu.memory_space<vmem>>, vector<1x128xf32>
    %cst_27 = arith.constant dense<0.000000e+00> : vector<128xf32>
    %32 = vector.multi_reduction <add>, %30, %cst_27 [0] : vector<8x128xf32> to vector<128xf32>
    %33 = vector.shape_cast %32 : vector<128xf32> to vector<1x128xf32>
    %34 = arith.addf %31, %33 : vector<1x128xf32>
    %c0_28 = arith.constant 0 : index
    %c0_29 = arith.constant 0 : index
    %35 = vector.load %arg18[%c0_28, %c0_29] : memref<1x128xf32, #tpu.memory_space<vmem>>, vector<1x128xf32>
    tpu.vector_store %arg18[%c0_28, %c0_29], %34 {strides = array<i32>} : memref<1x128xf32, #tpu.memory_space<vmem>>, vector<1x128xf32>,
    %c0_i32_30 = arith.constant 0 : i32
    %36 = arith.cmpi eq, %arg1, %c0_i32_30 : i32
    %37 = arith.extui %36 : i1 to i32
    %c0_i32_31 = arith.constant 0 : i32
    %38 = arith.cmpi ne, %37, %c0_i32_31 : i32
    scf.if %38 {
      %c0_32 = arith.constant 0 : index
      %c0_33 = arith.constant 0 : index
      %39 = vector.load %arg18[%c0_32, %c0_33] : memref<1x128xf32, #tpu.memory_space<vmem>>, vector<1x128xf32>
      %cst_34 = arith.constant 1.250000e-01 : f32
      %40 = vector.broadcast %cst_34 : f32 to vector<1x128xf32>
      %41 = arith.mulf %39, %40 : vector<1x128xf32>
      %c0_35 = arith.constant 0 : index
      %c0_36 = arith.constant 0 : index
      %42 = vector.load %arg12[%c0_35, %c0_36] : memref<128x128xf32, #tpu.memory_space<vmem>>, vector<128x128xf32>
      %cst_37 = arith.constant dense<0.000000e+00> : vector<1x128xf32>
      %43 = tpu.matmul %41, %42, %cst_37 {dimension_numbers = #tpu.dot_dimension_numbers<[1], [0], [0], [1], [0, 0, 1, 1], [], []>} : vector<1x128xf32>, vector<128x128xf32>, vector<1x128xf32> -> vector<1x128xf32>
      %c0_38 = arith.constant 0 : index
      %c0_39 = arith.constant 0 : index
      %44 = vector.load %arg13[%c0_38, %c0_39] : memref<1x128xf32, #tpu.memory_space<vmem>>, vector<1x128xf32>
      %45 = arith.addf %43, %44 : vector<1x128xf32>
      %c0_40 = arith.constant 0 : index
      %c0_41 = arith.constant 0 : index
      %c0_42 = arith.constant 0 : index
      %46 = vector.load %arg16[%c0_40, %c0_41, %c0_42] : memref<1x1x128xf32, #tpu.memory_space<vmem>>, vector<1x1x128xf32>
      %47 = vector.shape_cast %46 : vector<1x1x128xf32> to vector<1x128xf32>
      %48 = vector.shape_cast %45 : vector<1x128xf32> to vector<1x1x128xf32>
      tpu.vector_store %arg16[%c0_40, %c0_41, %c0_42], %48 {strides = array<i32>} : memref<1x1x128xf32, #tpu.memory_space<vmem>>, vector<1x1x128xf32>,
      %49 = vector.extract_strided_slice %45 {offsets = [0, 0], sizes = [1, 64], strides = [1, 1]} : vector<1x128xf32> to vector<1x64xf32>
      %50 = vector.extract_strided_slice %45 {offsets = [0, 64], sizes = [1, 64], strides = [1, 1]} : vector<1x128xf32> to vector<1x64xf32>
      %c0_43 = arith.constant 0 : index
      %c0_44 = arith.constant 0 : index
      %c0_45 = arith.constant 0 : index
      %51 = vector.load %arg4[%c0_43, %c0_44, %c0_45] : memref<1x1x64xf32, #tpu.memory_space<vmem>>, vector<1x1x64xf32>
      %52 = vector.shape_cast %51 : vector<1x1x64xf32> to vector<1x64xf32>
      %cst_46 = arith.constant 5.000000e-01 : f32
      %53 = vector.broadcast %cst_46 : f32 to vector<1x64xf32>
      %54 = arith.mulf %53, %50 : vector<1x64xf32>
      %55 = math.exp %54 : vector<1x64xf32>
      %56 = arith.mulf %52, %55 : vector<1x64xf32>
      %57 = arith.addf %49, %56 : vector<1x64xf32>
      %c0_47 = arith.constant 0 : index
      %c0_48 = arith.constant 0 : index
      %58 = vector.load %arg14[%c0_47, %c0_48] : memref<64x128xf32, #tpu.memory_space<vmem>>, vector<64x128xf32>
      %cst_49 = arith.constant dense<0.000000e+00> : vector<1x128xf32>
      %59 = tpu.matmul %57, %58, %cst_49 {dimension_numbers = #tpu.dot_dimension_numbers<[1], [0], [0], [1], [0, 0, 1, 1], [], []>} : vector<1x64xf32>, vector<64x128xf32>, vector<1x128xf32> -> vector<1x128xf32>
      %c0_50 = arith.constant 0 : index
      %c0_51 = arith.constant 0 : index
      %60 = vector.load %arg15[%c0_50, %c0_51] : memref<1x128xf32, #tpu.memory_space<vmem>>, vector<1x128xf32>
      %61 = arith.addf %59, %60 : vector<1x128xf32>
      %c0_52 = arith.constant 0 : index
      %c0_53 = arith.constant 0 : index
      %c0_54 = arith.constant 0 : index
      %62 = vector.load %arg17[%c0_52, %c0_53, %c0_54] : memref<1x1x128xf32, #tpu.memory_space<vmem>>, vector<1x1x128xf32>
      %63 = vector.shape_cast %62 : vector<1x1x128xf32> to vector<1x128xf32>
      %64 = vector.shape_cast %61 : vector<1x128xf32> to vector<1x1x128xf32>
      tpu.vector_store %arg17[%c0_52, %c0_53, %c0_54], %64 {strides = array<i32>} : memref<1x1x128xf32, #tpu.memory_space<vmem>>, vector<1x1x128xf32>,
    } else {
    }
    return
  }
  func.func @transform_0(%arg0: i32, %arg1: i32) -> (i32, i32, i32) {
    %c0_i32 = arith.constant 0 : i32
    %c0_i32_0 = arith.constant 0 : i32
    return %arg0, %arg1, %c0_i32 : i32, i32, i32
  }
  func.func @transform_1(%arg0: i32, %arg1: i32) -> (i32, i32, i32) {
    %c0_i32 = arith.constant 0 : i32
    %c0_i32_0 = arith.constant 0 : i32
    return %arg0, %arg1, %c0_i32 : i32, i32, i32
  }
  func.func @transform_2(%arg0: i32, %arg1: i32) -> (i32, i32, i32) {
    %c0_i32 = arith.constant 0 : i32
    %c0_i32_0 = arith.constant 0 : i32
    %c0_i32_1 = arith.constant 0 : i32
    return %arg0, %c0_i32, %c0_i32_0 : i32, i32, i32
  }
  func.func @transform_3(%arg0: i32, %arg1: i32) -> (i32, i32) {
    %c0_i32 = arith.constant 0 : i32
    %c0_i32_0 = arith.constant 0 : i32
    %c0_i32_1 = arith.constant 0 : i32
    return %c0_i32, %c0_i32_0 : i32, i32
  }
  func.func @transform_4(%arg0: i32, %arg1: i32) -> (i32, i32) {
    %c0_i32 = arith.constant 0 : i32
    %c0_i32_0 = arith.constant 0 : i32
    %c0_i32_1 = arith.constant 0 : i32
    return %c0_i32, %c0_i32_0 : i32, i32
  }
  func.func @transform_5(%arg0: i32, %arg1: i32) -> (i32, i32) {
    %c0_i32 = arith.constant 0 : i32
    %c0_i32_0 = arith.constant 0 : i32
    %c0_i32_1 = arith.constant 0 : i32
    return %c0_i32, %c0_i32_0 : i32, i32
  }
  func.func @transform_6(%arg0: i32, %arg1: i32) -> (i32, i32) {
    %c0_i32 = arith.constant 0 : i32
    %c0_i32_0 = arith.constant 0 : i32
    %c0_i32_1 = arith.constant 0 : i32
    return %c0_i32, %c0_i32_0 : i32, i32
  }
  func.func @transform_7(%arg0: i32, %arg1: i32) -> (i32, i32) {
    %c0_i32 = arith.constant 0 : i32
    %c0_i32_0 = arith.constant 0 : i32
    %c0_i32_1 = arith.constant 0 : i32
    return %c0_i32, %c0_i32_0 : i32, i32
  }
  func.func @transform_8(%arg0: i32, %arg1: i32) -> (i32, i32) {
    %c0_i32 = arith.constant 0 : i32
    %c0_i32_0 = arith.constant 0 : i32
    %c0_i32_1 = arith.constant 0 : i32
    return %c0_i32, %c0_i32_0 : i32, i32
  }
  func.func @transform_9(%arg0: i32, %arg1: i32) -> (i32, i32) {
    %c0_i32 = arith.constant 0 : i32
    %c0_i32_0 = arith.constant 0 : i32
    %c0_i32_1 = arith.constant 0 : i32
    return %c0_i32, %c0_i32_0 : i32, i32
  }
  func.func @transform_10(%arg0: i32, %arg1: i32) -> (i32, i32) {
    %c0_i32 = arith.constant 0 : i32
    %c0_i32_0 = arith.constant 0 : i32
    %c0_i32_1 = arith.constant 0 : i32
    return %c0_i32, %c0_i32_0 : i32, i32
  }
  func.func @transform_11(%arg0: i32, %arg1: i32) -> (i32, i32) {
    %c0_i32 = arith.constant 0 : i32
    %c0_i32_0 = arith.constant 0 : i32
    %c0_i32_1 = arith.constant 0 : i32
    return %c0_i32, %c0_i32_0 : i32, i32
  }
  func.func @transform_12(%arg0: i32, %arg1: i32) -> (i32, i32) {
    %c0_i32 = arith.constant 0 : i32
    %c0_i32_0 = arith.constant 0 : i32
    %c0_i32_1 = arith.constant 0 : i32
    return %c0_i32, %c0_i32_0 : i32, i32
  }
  func.func @transform_13(%arg0: i32, %arg1: i32) -> (i32, i32) {
    %c0_i32 = arith.constant 0 : i32
    %c0_i32_0 = arith.constant 0 : i32
    %c0_i32_1 = arith.constant 0 : i32
    return %c0_i32, %c0_i32_0 : i32, i32
  }
  func.func @transform_14(%arg0: i32, %arg1: i32) -> (i32, i32, i32) {
    %c0_i32 = arith.constant 0 : i32
    %c0_i32_0 = arith.constant 0 : i32
    %c0_i32_1 = arith.constant 0 : i32
    return %arg0, %c0_i32, %c0_i32_0 : i32, i32, i32
  }
  func.func @transform_15(%arg0: i32, %arg1: i32) -> (i32, i32, i32) {
    %c0_i32 = arith.constant 0 : i32
    %c0_i32_0 = arith.constant 0 : i32
    %c0_i32_1 = arith.constant 0 : i32
    return %arg0, %c0_i32, %c0_i32_0 : i32, i32, i32
  }
}

module attributes {stable_mosaic.version = 11 : i64} {
  func.func @decoder_kernel(%arg0: i32, %arg1: i32, %arg2: memref<1x1x128xf32, #tpu.memory_space<vmem>>, %arg3: memref<1x8x784xbf16, #tpu.memory_space<vmem>>, %arg4: memref<784x128xbf16, #tpu.memory_space<vmem>>, %arg5: memref<128x128xbf16, #tpu.memory_space<vmem>>, %arg6: memref<1x128xf32, #tpu.memory_space<vmem>>, %arg7: memref<128x128xbf16, #tpu.memory_space<vmem>>, %arg8: memref<1x128xf32, #tpu.memory_space<vmem>>, %arg9: memref<1x8x128xf32, #tpu.memory_space<vmem>>) attributes {dimension_semantics = [#tpu.dimension_semantics<parallel>, #tpu.dimension_semantics<parallel>], iteration_bounds = array<i64: 1, 2>, scalar_prefetch = 0 : i64, scratch_operands = 0 : i64, tpu.core_type = #tpu.core_type<tc>, window_params = [{transform_indices = @transform_0, window_bounds = array<i64: 1, 1, 128>}, {transform_indices = @transform_1, window_bounds = array<i64: 1, 8, 784>}, {pipeline_mode = #tpu.pipeline_mode<synchronous>, transform_indices = @transform_2, window_bounds = array<i64: 784, 128>}, {pipeline_mode = #tpu.pipeline_mode<synchronous>, transform_indices = @transform_3, window_bounds = array<i64: 128, 128>}, {pipeline_mode = #tpu.pipeline_mode<synchronous>, transform_indices = @transform_4, window_bounds = array<i64: 1, 128>}, {pipeline_mode = #tpu.pipeline_mode<synchronous>, transform_indices = @transform_5, window_bounds = array<i64: 128, 128>}, {pipeline_mode = #tpu.pipeline_mode<synchronous>, transform_indices = @transform_6, window_bounds = array<i64: 1, 128>}, {transform_indices = @transform_7, window_bounds = array<i64: 1, 8, 128>}]} {
    %c0 = arith.constant 0 : index
    %c0_0 = arith.constant 0 : index
    %c0_1 = arith.constant 0 : index
    %0 = vector.load %arg3[%c0, %c0_0, %c0_1] : memref<1x8x784xbf16, #tpu.memory_space<vmem>>, vector<1x8x784xbf16>
    %1 = vector.shape_cast %0 : vector<1x8x784xbf16> to vector<8x784xbf16>
    %c0_2 = arith.constant 0 : index
    %c0_3 = arith.constant 0 : index
    %c0_4 = arith.constant 0 : index
    %2 = vector.load %arg2[%c0_2, %c0_3, %c0_4] : memref<1x1x128xf32, #tpu.memory_space<vmem>>, vector<1x1x128xf32>
    %3 = vector.shape_cast %2 : vector<1x1x128xf32> to vector<1x128xf32>
    %c0_5 = arith.constant 0 : index
    %c0_6 = arith.constant 0 : index
    %4 = vector.load %arg4[%c0_5, %c0_6] : memref<784x128xbf16, #tpu.memory_space<vmem>>, vector<784x128xbf16>
    %cst = arith.constant dense<0.000000e+00> : vector<8x128xf32>
    %5 = tpu.matmul %1, %4, %cst {dimension_numbers = #tpu.dot_dimension_numbers<[1], [0], [0], [1], [0, 0, 1, 1], [], []>} : vector<8x784xbf16>, vector<784x128xbf16>, vector<8x128xf32> -> vector<8x128xf32>
    %6 = vector.broadcast %3 : vector<1x128xf32> to vector<8x128xf32>
    %7 = arith.addf %5, %6 : vector<8x128xf32>
    %cst_7 = arith.constant 0.000000e+00 : f32
    %8 = vector.broadcast %cst_7 : f32 to vector<8x128xf32>
    %9 = arith.maximumf %7, %8 : vector<8x128xf32>
    %10 = arith.truncf %9 : vector<8x128xf32> to vector<8x128xbf16>
    %c0_8 = arith.constant 0 : index
    %c0_9 = arith.constant 0 : index
    %11 = vector.load %arg5[%c0_8, %c0_9] : memref<128x128xbf16, #tpu.memory_space<vmem>>, vector<128x128xbf16>
    %cst_10 = arith.constant dense<0.000000e+00> : vector<8x128xf32>
    %12 = tpu.matmul %10, %11, %cst_10 {dimension_numbers = #tpu.dot_dimension_numbers<[1], [0], [0], [1], [0, 0, 1, 1], [], []>} : vector<8x128xbf16>, vector<128x128xbf16>, vector<8x128xf32> -> vector<8x128xf32>
    %c0_11 = arith.constant 0 : index
    %c0_12 = arith.constant 0 : index
    %13 = vector.load %arg6[%c0_11, %c0_12] : memref<1x128xf32, #tpu.memory_space<vmem>>, vector<1x128xf32>
    %14 = vector.broadcast %13 : vector<1x128xf32> to vector<8x128xf32>
    %15 = arith.addf %12, %14 : vector<8x128xf32>
    %cst_13 = arith.constant 0.000000e+00 : f32
    %16 = vector.broadcast %cst_13 : f32 to vector<8x128xf32>
    %17 = arith.maximumf %15, %16 : vector<8x128xf32>
    %18 = arith.truncf %17 : vector<8x128xf32> to vector<8x128xbf16>
    %c0_14 = arith.constant 0 : index
    %c0_15 = arith.constant 0 : index
    %19 = vector.load %arg7[%c0_14, %c0_15] : memref<128x128xbf16, #tpu.memory_space<vmem>>, vector<128x128xbf16>
    %cst_16 = arith.constant dense<0.000000e+00> : vector<8x128xf32>
    %20 = tpu.matmul %18, %19, %cst_16 {dimension_numbers = #tpu.dot_dimension_numbers<[1], [0], [0], [1], [0, 0, 1, 1], [], []>} : vector<8x128xbf16>, vector<128x128xbf16>, vector<8x128xf32> -> vector<8x128xf32>
    %c0_17 = arith.constant 0 : index
    %c0_18 = arith.constant 0 : index
    %21 = vector.load %arg8[%c0_17, %c0_18] : memref<1x128xf32, #tpu.memory_space<vmem>>, vector<1x128xf32>
    %22 = vector.broadcast %21 : vector<1x128xf32> to vector<8x128xf32>
    %23 = arith.addf %20, %22 : vector<8x128xf32>
    %c0_19 = arith.constant 0 : index
    %c0_20 = arith.constant 0 : index
    %c0_21 = arith.constant 0 : index
    %24 = vector.load %arg9[%c0_19, %c0_20, %c0_21] : memref<1x8x128xf32, #tpu.memory_space<vmem>>, vector<1x8x128xf32>
    %25 = vector.shape_cast %24 : vector<1x8x128xf32> to vector<8x128xf32>
    %26 = vector.shape_cast %23 : vector<8x128xf32> to vector<1x8x128xf32>
    tpu.vector_store %arg9[%c0_19, %c0_20, %c0_21], %26 {strides = array<i32>} : memref<1x8x128xf32, #tpu.memory_space<vmem>>, vector<1x8x128xf32>,
    return
  }
  func.func @transform_0(%arg0: i32, %arg1: i32) -> (i32, i32, i32) {
    %c0_i32 = arith.constant 0 : i32
    %c0_i32_0 = arith.constant 0 : i32
    %c0_i32_1 = arith.constant 0 : i32
    return %arg1, %c0_i32, %c0_i32_0 : i32, i32, i32
  }
  func.func @transform_1(%arg0: i32, %arg1: i32) -> (i32, i32, i32) {
    %c0_i32 = arith.constant 0 : i32
    %c0_i32_0 = arith.constant 0 : i32
    return %arg1, %arg0, %c0_i32 : i32, i32, i32
  }
  func.func @transform_2(%arg0: i32, %arg1: i32) -> (i32, i32) {
    %c0_i32 = arith.constant 0 : i32
    %c0_i32_0 = arith.constant 0 : i32
    %c0_i32_1 = arith.constant 0 : i32
    return %c0_i32, %c0_i32_0 : i32, i32
  }
  func.func @transform_3(%arg0: i32, %arg1: i32) -> (i32, i32) {
    %c0_i32 = arith.constant 0 : i32
    %c0_i32_0 = arith.constant 0 : i32
    %c0_i32_1 = arith.constant 0 : i32
    return %c0_i32, %c0_i32_0 : i32, i32
  }
  func.func @transform_4(%arg0: i32, %arg1: i32) -> (i32, i32) {
    %c0_i32 = arith.constant 0 : i32
    %c0_i32_0 = arith.constant 0 : i32
    %c0_i32_1 = arith.constant 0 : i32
    return %c0_i32, %c0_i32_0 : i32, i32
  }
  func.func @transform_5(%arg0: i32, %arg1: i32) -> (i32, i32) {
    %c0_i32 = arith.constant 0 : i32
    %c0_i32_0 = arith.constant 0 : i32
    %c0_i32_1 = arith.constant 0 : i32
    return %c0_i32, %c0_i32_0 : i32, i32
  }
  func.func @transform_6(%arg0: i32, %arg1: i32) -> (i32, i32) {
    %c0_i32 = arith.constant 0 : i32
    %c0_i32_0 = arith.constant 0 : i32
    %c0_i32_1 = arith.constant 0 : i32
    return %c0_i32, %c0_i32_0 : i32, i32
  }
  func.func @transform_7(%arg0: i32, %arg1: i32) -> (i32, i32, i32) {
    %c0_i32 = arith.constant 0 : i32
    %c0_i32_0 = arith.constant 0 : i32
    return %arg1, %arg0, %c0_i32 : i32, i32, i32
  }
}

</mosaic_0001>

<bundles_post_ra>
// kernel: neural_process_forward.2
= control target key start
LH: loop header
LB: loop body
LE: loop exit
PB: predicated region body
PF: predicated region fallthrough
CT: control target
= control target key end

     0   :  { %s3012_s0 = inlined_call_operand.vmem [shape: bf16[2,8,784], index: 0, kind: input, shape index: {}]   ;;  %s3013_s1 = inlined_call_operand.vmem [shape: bf16[2,8,10], index: 1, kind: input, shape index: {}]   ;;  %s3014_s2 = inlined_call_operand.hbm [shape: f32[2,1,64], index: 2, kind: input, shape index: {}]   ;;  %s3015_s3 = inlined_call_operand.hbm [shape: bf16[784,128], index: 3, kind: input, shape index: {}]   ;;  %s3016_s4 = inlined_call_operand.hbm [shape: bf16[10,128], index: 4, kind: input, shape index: {}]   ;;  %s3017_s5 = inlined_call_operand.hbm [shape: f32[1,128], index: 5, kind: input, shape index: {}]   ;;  %s3018_s6 = inlined_call_operand.vmem [shape: bf16[128,128], index: 6, kind: input, shape index: {}]   ;;  %s3019_s7 = inlined_call_operand.hbm [shape: f32[1,128], index: 7, kind: input, shape index: {}]   ;;  %s3020_s8 = inlined_call_operand.hbm [shape: bf16[128,128], index: 8, kind: input, shape index: {}]   ;;  %s3021_s9 = inlined_call_operand.hbm [shape: f32[1,128], index: 9, kind: input, shape index: {}]   ;;  %s3022_s10 = inlined_call_operand.vmem [shape: f32[128,128], index: 10, kind: input, shape index: {}]   ;;  %s3023_s11 = inlined_call_operand.hbm [shape: f32[1,128], index: 11, kind: input, shape index: {}]   ;;  %s3024_s12 = inlined_call_operand.hbm [shape: f32[64,128], index: 12, kind: input, shape index: {}]   ;;  %s3025_s13 = inlined_call_operand.hbm [shape: f32[1,128], index: 13, kind: input, shape index: {}]   ;;  %s3026_s14 = inlined_call_operand.vmem [shape: f32[2,1,128], index: 14, kind: output, shape index: {0}]   ;;  %s3027_s15 = inlined_call_operand.vmem [shape: f32[2,1,128], index: 15, kind: output, shape index: {1}]  }
   0x1   :  { %3031 = sst [smem:[#allocation26_spill]] %s3012_s0 }
   0x2   :  { %3032 = sst [smem:[#allocation27_spill]] %s3013_s1 }
   0x3   :  { %3033 = sst [smem:[#allocation28_spill]] %s3015_s3 }
   0x4   :  { %3034 = sst [smem:[#allocation29_spill]] %s3017_s5 }
   0x5   :  { %3035 = sst [smem:[#allocation30_spill]] %s3018_s6 }
   0x6   :  { %3036 = sst [smem:[#allocation31_spill]] %s3022_s10 }
   0x7   :  { %3037 = sst [smem:[#allocation32_spill]] %s3026_s14 }
   0x8   :  { %3038 = sst [smem:[#allocation33_spill]] %s3027_s15 }
   0x9   :  { %21 = vsyncpa [#allocation4], 0 }
   0xa   :  { %23 = vsyncpa [#allocation4 + $0x1], 0 }
   0xb   :  { %24 = vsyncpa [#allocation6], 0 }
   0xc   :  { %25 = vsyncpa [#allocation9], 0 }
   0xd   :  { %26 = vsyncpa [#allocation12], 0 }
   0xe   :  { %27 = vsyncpa [#allocation15], 0 }
   0xf   :  { %28 = vsyncpa [#allocation18], 0  ;;  %s2740_s18 = smov 0   ;;  %s2742_s19 = smov 0  }
  0x10   :  { %s2744_s20 = smov 0   ;;  %s2746_s21 = smov 0  }
  0x11   :  { %s2748_s22 = smov 0   ;;  %s2750_s23 = smov 0  }
  0x12 LB: > { %3039 = sst [smem:[#allocation25_spill]] %s2635_s21  ;;  %s1755_s24 = sadd.s32 4294967295, %s2643_s23   ;;  %s2643_s23 = sphi %s2750_s23, %s34_s23   ;;  %s2639_s22 = sphi %s2748_s22, %s3059_s22   ;;  %s2635_s21 = sphi %s2746_s21, %s3058_s21   ;;  %s2631_s20 = sphi %s2744_s20, %s3057_s20   ;;  %s2627_s19 = sphi %s2742_s19, %s3056_s19   ;;  %s2623_s18 = sphi %s2740_s18, %s3055_s18  }
  0x13   : > { %p1757_p0 = scmp.ge.s32.totalorder %s2643_s23, 1  ;;  %p2772_p1 = scmp.eq.s32.totalorder %s1755_s24, 0 }
  0x14   : > { %p416_p2 = scmp.lt.s32.totalorder %s2643_s23, 3  ;;  %s3041_s3 = sld [smem:[#allocation28_spill]] }
  0x15   : > { %s2645_s30 = smov [#allocation5]   ;;  %s3044_s5 = sld [smem:[#allocation29_spill]] }
  0x16   : > { %p2780_p3 = pnand %p1757_p0, %p416_p2  ;;  %s429_s16 = sshll.u32 %s2645_s30, 4  ;;  %s430_s16 = int_to_ptr.vmem [resolvable:$true] %s429_s16 }
  0x17   : > { %s2646_s27 = smov 64   ;;  %s2648_s14 = smov [#allocation8]  }
  0x18   : > { %p2154_p4 = pneg %p2780_p3  ;;  %s458_s30 = sshll.u32 %s2648_s14, 4  ;;  %s459_s30 = int_to_ptr.vmem [resolvable:$true] %s458_s30 }
  0x19   : > { %s482_s0 = sshll.u32 %s3020_s8, 4  ;;  %s2649_s1 = smov [#allocation11]   ;;  %s483_s0 = int_to_ptr.hbm [resolvable:$true] %s482_s0 }
  0x1a   : > { %s427_s28 = sshll.u32 %s3041_s3, 4  ;;  %p2788_p5 = pnand %p2154_p4, %p2772_p1  ;;  %s428_s28 = int_to_ptr.hbm [resolvable:$true] %s427_s28 }
  0x1b   : > { %s456_s26 = sshll.u32 %s3044_s5, 4  ;;  %s2647_s3 = smov 4   ;;  %s457_s26 = int_to_ptr.hbm [resolvable:$true] %s456_s26 }
  0x1c   : > { %2157 = dma.hbm_to_vmem [thread:$0]  (!%p2788_p5), %s428_s28, 6272, %s430_s16, [#allocation6], %s2646_s27, %s2646_s27, %s2647_s3  }
  0x1d   : > { %2163 = dma.hbm_to_vmem [thread:$0]  (!%p2788_p5), %s457_s26, 16, %s459_s30, [#allocation9]  }
  0x1e   : > { %s512_s5 = sshll.u32 %s3023_s11, 4  ;;  %s484_s21 = sshll.u32 %s2649_s1, 4  ;;  %s513_s5 = int_to_ptr.hbm [resolvable:$true] %s512_s5  ;;  %s485_s21 = int_to_ptr.vmem [resolvable:$true] %s484_s21 }
  0x1f   : > { %2169 = dma.hbm_to_vmem [thread:$0]  (!%p2788_p5), %s483_s0, 1024, %s485_s21, [#allocation12], %s2646_s27, %s2646_s27, %s2647_s3  }
  0x20   : > { %s2650_s14 = smov [#allocation14]   ;;  %s441_s16 = sshll.u32 %s3016_s4, 4  ;;  %s442_s16 = int_to_ptr.hbm [resolvable:$true] %s441_s16 }
  0x21   : > { %s514_s28 = sshll.u32 %s2650_s14, 4  ;;  %s471_s15 = sshll.u32 %s3019_s7, 4  ;;  %s515_s28 = int_to_ptr.vmem [resolvable:$true] %s514_s28  ;;  %s472_s15 = int_to_ptr.hbm [resolvable:$true] %s471_s15 }
  0x22   : > { %2175 = dma.hbm_to_vmem [thread:$0]  (!%p2788_p5), %s513_s5, 16, %s515_s28, [#allocation15]  }
  0x23   : > { %s2651_s1 = smov [#allocation7]   ;;  %s2652_s0 = smov [#allocation10]  }
  0x24   : > { %s443_s24 = sshll.u32 %s2651_s1, 4  ;;  %s473_s21 = sshll.u32 %s2652_s0, 4  ;;  %s444_s24 = int_to_ptr.vmem [resolvable:$true] %s443_s24  ;;  %s474_s21 = int_to_ptr.vmem [resolvable:$true] %s473_s21 }
  0x25   : > { %2160 = dma.hbm_to_vmem [thread:$0]  (!%p2788_p5), %s442_s16, 128, %s444_s24, [#allocation6], %s2646_s27, %s2646_s27, %s2647_s3  }
  0x26   : > { %s497_s10 = sshll.u32 %s3021_s9, 4  ;;  %s523_s26 = sshll.u32 %s3024_s12, 4  ;;  %s498_s10 = int_to_ptr.hbm [resolvable:$true] %s497_s10  ;;  %s524_s26 = int_to_ptr.hbm [resolvable:$true] %s523_s26 }
  0x27   : > { %2166 = dma.hbm_to_vmem [thread:$0]  (!%p2788_p5), %s472_s15, 16, %s474_s21, [#allocation9]  }
  0x28   : > { %s2653_s30 = smov [#allocation13]   ;;  %s2654_s3 = smov [#allocation16]  }
  0x29   : > { %s499_s1 = sshll.u32 %s2653_s30, 4  ;;  %s525_s27 = sshll.u32 %s2654_s3, 4  ;;  %s500_s1 = int_to_ptr.vmem [resolvable:$true] %s499_s1  ;;  %s526_s27 = int_to_ptr.vmem [resolvable:$true] %s525_s27 }
  0x2a   : > { %2172 = dma.hbm_to_vmem [thread:$0]  (!%p2788_p5), %s498_s10, 16, %s500_s1, [#allocation12]  }
  0x2b   : > { %s2655_s16 = smov 128   ;;  %s2656_s15 = smov 8  }
  0x2c   : > { %2178 = dma.hbm_to_vmem [thread:$0]  (!%p2788_p5), %s524_s26, 1024, %s526_s27, [#allocation15], %s2655_s16, %s2655_s16, %s2656_s15  }
  0x2d   : > { %s538_s21 = sshll.u32 %s3025_s13, 4  ;;  %s2657_s14 = smov [#allocation17]   ;;  %s539_s21 = int_to_ptr.hbm [resolvable:$true] %s538_s21 }
  0x2e   : > { %s540_s6 = sshll.u32 %s2657_s14, 4  ;;  %s46_s10 = sadd.s32 1, %s2639_s22  ;;  %s541_s6 = int_to_ptr.vmem [resolvable:$true] %s540_s6 }
  0x2f   : > { %2181 = dma.hbm_to_vmem [thread:$0]  (!%p2788_p5), %s539_s21, 16, %s541_s6, [#allocation18]  }
  0x30   : > { %p48_p6 = scmp.ge.s32.totalorder %s46_s10, 2  ;;  %s109_s5 = sadd.s32 1, %s2631_s20 }
  0x31   : > { %p116_p7 = scmp.ne.s32.totalorder %s2631_s20, %s2627_s19  ;;  %p117_p8 = scmp.eq.s32.totalorder %s2643_s23, 0 }
  0x32   : > { %s3061_s10 = smov (%p48_p6, %s46_s10), 0  ;;  %p122_p10 = scmp.ne.s32.totalorder %s2627_s19, %s2623_s18 }
  0x33   : > { %p2841_p9 = por %p117_p8, %p116_p7  ;;  %s106_s26 = ssub.s32 %s2639_s22, %s3061_s10 }
  0x34   : > { %p2195_p11 = scmp.lt.s32.totalorder %s2643_s23, 2  ;;  %p107_p12 = scmp.eq.s32.totalorder %s106_s26, 0 }
  0x35   : > { %p2852_p13 = por %p2772_p1, %p122_p10  ;;  %s573_s30 = sand.u32 1, %s2631_s20  }
  0x36   : > { %s579_s27 = scalar_lea.hbm %s3014_s2, %s2639_s22  ;;  %s576_s24 = scalar_lea.vmem [#allocation3], %s573_s30 }
  0x37   : > { %s2862_s16 = scalar_select %p107_p12, %s2631_s20, %s109_s5  }
  0x38   : > { %s581_s15 = sshll.u32 %s579_s27, 4  ;;  %s583_s0 = sshll.u32 %s576_s24, 4  ;;  %s582_s15 = int_to_ptr.hbm [resolvable:$true] %s581_s15  ;;  %s584_s0 = int_to_ptr.vmem [resolvable:$true] %s583_s0 }
  0x39   : > { %p2183_p0 = pnand %p2195_p11, %p2841_p9  ;;  %s574_s18 = scalar_lea.sflag [#allocation4], %s573_s30 }
  0x3a   : > { %592 = sbr.rel (%p2780_p3) target bundleno = 964 (0x3c4), region = 76  ;;  %s594_s21 = sand.u32 (!%p2780_p3), 1, %s2627_s19  }
  0x3b   : > { %2185 = dma.hbm_to_vmem [thread:$0]  (!%p2183_p0), %s582_s15, 16, %s584_s0, %s574_s18  }
  0x3c   : > { %s595_s14 = scalar_lea.sflag (!%p2780_p3), [#allocation4], %s594_s21  ;;  %s2869_s6 = scalar_lea.vmem (!%p2780_p3), [#allocation3], %s594_s21 }
  0x3f   : > { %2598 = dma.done.wait (%p2852_p13), %s595_s14, 16  }
  0x40   : > { %2600 = vsyncadd (%p2852_p13), %s595_s14, 4294967280 }
  0x41   : > { %2602 = dma.done.wait (%p2772_p1), [#allocation6], 6400  }
  0x42   : > { %2604 = vsyncadd (%p2772_p1), [#allocation6], 4294960896 }
  0x43   : > { %2606 = dma.done.wait (%p2772_p1), [#allocation9], 32  }
  0x44   : > { %2608 = vsyncadd (%p2772_p1), [#allocation9], 4294967264 }
  0x45   : > { %2610 = dma.done.wait (%p2772_p1), [#allocation12], 1040  }
  0x46   : > { %2612 = vsyncadd (%p2772_p1), [#allocation12], 4294966256 }
  0x47   : > { %2614 = dma.done.wait (%p2772_p1), [#allocation15], 1040  }
  0x48   : > { %2616 = vsyncadd (%p2772_p1), [#allocation15], 4294966256 }
  0x49   : > { %2618 = dma.done.wait (%p2772_p1), [#allocation18], 16  }
  0x4a   : > { %2620 = vsyncadd (%p2772_p1), [#allocation18], 4294967280  ;;  %s3047_s29 = sld [smem:[#allocation25_spill]]  ;;  %v2056_v0 = vld [vmem:[#allocation5 + $0x38] sm:$0xff]  ;;  %v2055_v3 = vld [vmem:[#allocation5 + $0x30] sm:$0xff]  ;;  %vm848_vm0 = vcmask 1044480  }
  0x4b   : > { %v2064_v1 = vld [vmem:[#allocation5 + $0x78] sm:$0xff]  ;;  %1187 = vmatpush.bf16.msra.mxu1 %v2056_v0  ;;  %v2063_v4 = vld [vmem:[#allocation5 + $0x70] sm:$0xff]  ;;  %v1782_v6 = vld [vmem:[#allocation7] sm:$0xf]  ;;  %s3048_s26 = sld [smem:[#allocation27_spill]]  ;;  %vm844_vm1 = vcmask 80896  }
  0x4c   : > { %v2072_v2 = vld [vmem:[#allocation5 + $0xb8] sm:$0xff]  ;;  %1200 = vmatpush.bf16.msra.mxu2 %v2064_v1  ;;  %v2071_v5 = vld [vmem:[#allocation5 + $0xb0] sm:$0xff]  ;;  %v2098_v7 = vld [vmem:[#allocation7] sm:$0x10]  ;;  %s3049_s27 = sld [smem:[#allocation26_spill]]  ;;  %vm1183_vm2 = vcmask 130048  }
  0x4d   : > { %1213 = vmatpush.bf16.msra.mxu3 %v2072_v2  ;;  %v2054_v8 = vld [vmem:[#allocation5 + $0x28] sm:$0xff]  ;;  %v1783_v10 = vor.u32 %v2098_v7, %v1782_v6  ;;  %v2080_v12 = vld [vmem:[#allocation5 + $0xf8] sm:$0xff]  ;;  %v2053_v14 = vld [vmem:[#allocation5 + $0x20] sm:$0xff]  ;;  %s3050_s18 = sld [smem:[#allocation30_spill]]  ;;  %s2659_s24 = smov 64   ;;  %vm1520_vm3 = vcmask 523264  }
  0x4e   : > { %v2062_v9 = vld [vmem:[#allocation5 + $0x68] sm:$0xff]  ;;  %v2061_v15 = vld [vmem:[#allocation5 + $0x60] sm:$0xff]  ;;  %v2079_v17 = vld [vmem:[#allocation5 + $0xf0] sm:$0xff]  ;;  %s3052_s5 = sld [smem:[#allocation31_spill]] }
  0x4f   : > { %1188 = vmatpush.bf16.msra.mxu1 %v2055_v3  ;;  %v2070_v11 = vld [vmem:[#allocation5 + $0xa8] sm:$0xff]  ;;  %v850_v13 = vsel %vm848_vm0, %v1783_v10, 0  ;;  %v2069_v16 = vld [vmem:[#allocation5 + $0xa0] sm:$0xff]  ;;  %v2052_v19 = vld [vmem:[#allocation5 + $0x18] sm:$0xff]  ;;  %s3054_s21 = sld [smem:[#allocation33_spill]] }
  0x50   : > { %p706_p2 = scmp.lt.s32.totalorder %s3047_s29, 1  ;;  %1201 = vmatpush.bf16.msra.mxu2 %v2063_v4  ;;  %859 = vmatpush.bf16.msra.mxu0 %v850_v13  ;;  %v2060_v20 = vld [vmem:[#allocation5 + $0x58] sm:$0xff]  ;;  %v2078_v22 = vld [vmem:[#allocation5 + $0xe8] sm:$0xff]  ;;  %v2051_v23 = vld [vmem:[#allocation5 + $0x10] sm:$0xff] }
  0x51   : > { %1214 = vmatpush.bf16.msra.mxu3 %v2071_v5  ;;  %v2068_v21 = vld [vmem:[#allocation5 + $0x98] sm:$0xff]  ;;  %v2059_v24 = vld [vmem:[#allocation5 + $0x50] sm:$0xff]  ;;  %v2077_v26 = vld [vmem:[#allocation5 + $0xe0] sm:$0xff] }
  0x52   : > { %s3063_s29 = smov (!%p706_p2, %s3047_s29), 1  ;;  %v2067_v25 = vld [vmem:[#allocation5 + $0x90] sm:$0xff]  ;;  %v2050_v27 = vld [vmem:[#allocation5 + $0x8] sm:$0xff]  ;;  %v2076_v31 = vld [vmem:[#allocation5 + $0xd8] sm:$0xff] }
  0x53   : > { %s1779_s25 = sshll.u32 %s3063_s29, 2  ;;  %1189 = vmatpush.bf16.msra.mxu1 %v2054_v8  ;;  %s2115_s30 = smul.u32 28, %s3063_s29  ;;  %v2058_v28 = vld [vmem:[#allocation5 + $0x48] sm:$0xff]  ;;  %v2049_v35 = vld [vmem:[#allocation5] sm:$0xff]  ;;  %v2088_v37 = vld [vmem:[#allocation5 + $0x138] sm:$0xff] }
  0x54   : > { %s721_s17 = scalar_lea.vmem %s3048_s26, %s1779_s25  ;;  %1202 = vmatpush.bf16.msra.mxu2 %v2062_v9  ;;  %1226 = vmatpush.bf16.msrb.mxu0 %v2080_v12  ;;  %v2066_v30 = vld [vmem:[#allocation5 + $0x88] sm:$0xff]  ;;  %v2057_v36 = vld [vmem:[#allocation5 + $0x40] sm:$0xff]  ;;  %v2096_v38 = vld [vmem:[#allocation5 + $0x178] sm:$0xff]  ;;  %s3051_s14 = smov %s3050_s18 }
  0x55   : > { %1215 = vmatpush.bf16.msra.mxu3 %v2070_v11  ;;  %v738_v18 = vld [vmem:[%s721_s17] sm:$0xf]  ;;  %s2907_s15 = scalar_lea.vmem %s3049_s27, %s2115_s30  ;;  %v2075_v41 = vld [vmem:[#allocation5 + $0xd0] sm:$0xff]  ;;  %v2074_v48 = vld [vmem:[#allocation5 + $0xc8] sm:$0xff]  ;;  %s3053_s27 = sld [smem:[#allocation32_spill]] }
  0x56   : > { %1784 = vmatmul.msk.bf16.vlgmr.msra.gmra.mxu0 %vm844_vm1, %v738_v18  ;;  %v734_v29 = vld [vmem:[%s2907_s15] sm:$0xff]  ;;  %v735_v33 = vld [vmem:[%s2907_s15 + $0x8] sm:$0xff]  ;;  %v2087_v45 = vld [vmem:[#allocation5 + $0x130] sm:$0xff]  ;;  %s727_s25 = scalar_lea.vmem %s3054_s21, %s3063_s29 }
  0x57   : > { %1190 = vmatpush.bf16.msra.mxu1 %v2053_v14  ;;  %v870_v32 = vunpack.c.h.b16 %v734_v29  ;;  %v869_v34 = vunpack.c.l.b16 %v734_v29  ;;  %v2065_v39 = vld [vmem:[#allocation5 + $0x80] sm:$0xff]  ;;  %v871_v40 = vunpack.c.l.b16 %v735_v33  ;;  %v2095_v46 = vld [vmem:[#allocation5 + $0x170] sm:$0xff]  ;;  %v2086_v49 = vld [vmem:[#allocation5 + $0x128] sm:$0xff]  ;;  %v872_v51 = vunpack.c.h.b16 %v735_v33 }
  0x58   : > { %1203 = vmatpush.bf16.msra.mxu2 %v2061_v15  ;;  %1227 = vmatpush.bf16.msrb.mxu0 %v2079_v17  ;;  %v2097_v44 = vld [vmem:[#allocation5 + $0x180] sm:$0xff]  ;;  %v2094_v50 = vld [vmem:[#allocation5 + $0x168] sm:$0xff]  ;;  %v737_v56 = vld [vmem:[%s2907_s15 + $0x18] sm:$0xf] }
  0x59   : > { %1216 = vmatpush.bf16.msra.mxu3 %v2069_v16  ;;  %v877_v42 = vpack.c.b16 %v870_v32, %v870_v32  ;;  %v876_v43 = vpack.c.b16 %v869_v34, %v869_v34  ;;  %v878_v47 = vpack.c.b16 %v871_v40, %v871_v40  ;;  %v2073_v52 = vld [vmem:[#allocation5 + $0xc0] sm:$0xff]  ;;  %v879_v55 = vpack.c.b16 %v872_v51, %v872_v51  ;;  %v2084_v57 = vld [vmem:[#allocation5 + $0x118] sm:$0xff]  ;;  %v2083_v60 = vld [vmem:[#allocation5 + $0x110] sm:$0xff] }
  0x5a   : > { %v2085_v53 = vld [vmem:[#allocation5 + $0x120] sm:$0xff]  ;;  %v2092_v58 = vld [vmem:[#allocation5 + $0x158] sm:$0xff]  ;;  %v875_v59 = vunpack.c.l.b16 %v737_v56  ;;  %v2091_v61 = vld [vmem:[#allocation5 + $0x150] sm:$0xff] }
  0x5b   : > { %1191 = vmatpush.bf16.msra.mxu1 %v2052_v19  ;;  %v2093_v54 = vld [vmem:[#allocation5 + $0x160] sm:$0xff]  ;;  %v2082_v63 = vld [vmem:[#allocation5 + $0x108] sm:$0xff]  ;;  %v2106_v8 = vld [vmem:[%s3050_s18 + $0x38] sm:$0xff] }
  0x5c   : > { %1204 = vmatpush.bf16.msra.mxu2 %v2060_v20  ;;  %1228 = vmatpush.bf16.msrb.mxu0 %v2078_v22  ;;  %v882_v62 = vpack.c.b16 %v875_v59, %v875_v59  ;;  %v2090_v0 = vld [vmem:[#allocation5 + $0x148] sm:$0xff]  ;;  %v2081_v4 = vld [vmem:[#allocation5 + $0x100] sm:$0xff]  ;;  %v2102_v14 = vld [vmem:[%s3051_s14 + $0x18] sm:$0xff] }
  0x5d   : > { %1217 = vmatpush.bf16.msra.mxu3 %v2068_v21  ;;  %v736_v1 = vld [vmem:[%s2907_s15 + $0x10] sm:$0xff]  ;;  %v2089_v5 = vld [vmem:[#allocation5 + $0x140] sm:$0xff]  ;;  %v1478_v51 = vld [vmem:[%s3052_s5 + $0x78] sm:$0xff]  ;;  %s724_s15 = scalar_lea.vmem %s3053_s27, %s3063_s29 }
  0x5e   : > { %v873_v2 = vunpack.c.l.b16 %v736_v1  ;;  %v874_v3 = vunpack.c.h.b16 %v736_v1  ;;  %v2105_v10 = vld [vmem:[%s3051_s14 + $0x30] sm:$0xff]  ;;  %v2104_v11 = vld [vmem:[%s3051_s14 + $0x28] sm:$0xff]  ;;  %v2103_v13 = vld [vmem:[%s3051_s14 + $0x20] sm:$0xff] }
  0x5f   : > { %1192 = vmatpush.bf16.msra.mxu1 %v2051_v23  ;;  %v2101_v16 = vld [vmem:[%s3051_s14 + $0x10] sm:$0xff]  ;;  %v2100_v17 = vld [vmem:[%s3051_s14 + $0x8] sm:$0xff]  ;;  %v2099_v21 = vld [vmem:[%s3051_s14] sm:$0xff] }
  0x60   : > { %1205 = vmatpush.bf16.msra.mxu2 %v2059_v24  ;;  %1229 = vmatpush.bf16.msrb.mxu0 %v2077_v26  ;;  %v880_v6 = vpack.c.b16 %v873_v2, %v873_v2  ;;  %v881_v7 = vpack.c.b16 %v874_v3, %v874_v3  ;;  %v2114_v24 = vld [vmem:[#allocation11 + $0x38] sm:$0xff]  ;;  %v2112_v29 = vld [vmem:[#allocation11 + $0x28] sm:$0xff] }
  0x61   : > { %1218 = vmatpush.bf16.msra.mxu3 %v2067_v25  ;;  %v2113_v25 = vld [vmem:[#allocation11 + $0x30] sm:$0xff]  ;;  %v2110_v34 = vld [vmem:[#allocation11 + $0x18] sm:$0xff]  ;;  %v1470_v2 = vld [vmem:[%s3052_s5 + $0x38] sm:$0xff] }
  0x62   : > { %v1471_v1 = vld [vmem:[%s3052_s5 + $0x40] sm:$0xff]  ;;  %v1469_v3 = vld [vmem:[%s3052_s5 + $0x30] sm:$0xff] }
  0x63   : > { %1193 = vmatpush.bf16.msra.mxu1 %v2050_v27 }
  0x64   : > { %1206 = vmatpush.bf16.msra.mxu2 %v2058_v28  ;;  %1230 = vmatpush.bf16.msrb.mxu0 %v2076_v31  ;;  %v2111_v31 = vld [vmem:[#allocation11 + $0x20] sm:$0xff] }
  0x65   : > { %1219 = vmatpush.bf16.msra.mxu3 %v2066_v30 }
  0x67   : > { %1194 = vmatpush.bf16.msra.mxu1 %v2049_v35 }
  0x68   : > { %1207 = vmatpush.bf16.msra.mxu2 %v2057_v36  ;;  %1231 = vmatpush.bf16.msrb.mxu0 %v2075_v41 }
  0x69   : > { %1220 = vmatpush.bf16.msra.mxu3 %v2065_v39 }
  0x6a   : > { %1195 = vmatmul.bf16.vlgmr.msra.gmra.mxu1 %v876_v43 }
  0x6b   : > { %1239 = vmatpush.bf16.msrb.mxu1 %v2088_v37  ;;  %1208 = vmatmul.bf16.vlgmr.msra.gmra.mxu2 %v877_v42  ;;  %v2109_v37 = vld [vmem:[#allocation11 + $0x10] sm:$0xff]  ;;  %v2268_v42 = vld [vmem:[#allocation8] ss:$0 sm:$0xff] }
  0x6c   : > { %1252 = vmatpush.bf16.msrb.mxu2 %v2096_v38  ;;  %1221 = vmatmul.bf16.vlgmr.msra.gmra.mxu3 %v878_v47 }
  0x6d   : > { %1272 = vmatpush.bf16.msrb.mxu3 %v2097_v44  ;;  %1232 = vmatpush.bf16.msrb.mxu0 %v2074_v48 }
  0x6f   : > { %1240 = vmatpush.bf16.msrb.mxu1 %v2087_v45 }
  0x70   : > { %1253 = vmatpush.bf16.msrb.mxu2 %v2095_v46 }
  0x71   : > { %1233 = vmatpush.bf16.msrb.mxu0 %v2073_v52  ;;  %1436 = vmatpush.bf16.msra.mxu3 %v2114_v24  ;;  %v1477_v52 = vld [vmem:[%s3052_s5 + $0x70] sm:$0xff] }
  0x72   : > { %v1518_v24 = vld [vmem:[#allocation16 + $0x38] sm:$0xff] }
  0x73   : > { %1241 = vmatpush.bf16.msrb.mxu1 %v2086_v49  ;;  %v2108_v49 = vld [vmem:[#allocation11 + $0x8] sm:$0xff] }
  0x74   : > { %1254 = vmatpush.bf16.msrb.mxu2 %v2094_v50  ;;  %1234 = vmatmul.bf16.vlgmr.msrb.gmra.mxu0 %v879_v55  ;;  %v2107_v50 = vld [vmem:[#allocation11] sm:$0xff] }
  0x75   : > { %1353 = vmatpush.bf16.msra.mxu0 %v2106_v8  ;;  %1437 = vmatpush.bf16.msra.mxu3 %v2113_v25  ;;  %v1464_v8 = vld [vmem:[%s3052_s5 + $0x8] sm:$0xff] }
  0x76   : > { %v1517_v25 = vld [vmem:[#allocation16 + $0x30] sm:$0xff] }
  0x77   : > { %1242 = vmatpush.bf16.msrb.mxu1 %v2085_v53  ;;  %v2658_v53 = vmov 0.0  }
  0x78   : > { %1255 = vmatpush.bf16.msrb.mxu2 %v2093_v54  ;;  %733 = vst [vmem:[#allocation2] sm:$0x1] %v2658_v53  ;;  %v2269_v54 = vld [vmem:[#allocation10] ss:$0 sm:$0xff] }
  0x79   : > { %1354 = vmatpush.bf16.msra.mxu0 %v2105_v10  ;;  %1438 = vmatpush.bf16.msra.mxu3 %v2112_v29  ;;  %v2270_v10 = vld [vmem:[#allocation13] ss:$0 sm:$0xff]  ;;  %v1513_v29 = vld [vmem:[#allocation16 + $0x10] sm:$0xff] }
  0x7b   : > { %1243 = vmatpush.bf16.msrb.mxu1 %v2084_v57 }
  0x7c   : > { %1256 = vmatpush.bf16.msrb.mxu2 %v2092_v58  ;;  %1981 = vmatmul.msk.bf16.vlgmr.msrb.gmra.mxu3 %vm1183_vm2, %v882_v62  ;;  %v1474_v62 = vld [vmem:[%s3052_s5 + $0x58] sm:$0xff] }
  0x7d   : > { %1355 = vmatpush.bf16.msra.mxu0 %v2104_v11  ;;  %1439 = vmatpush.bf16.msra.mxu3 %v2111_v31 }
  0x7f   : > { %1244 = vmatpush.bf16.msrb.mxu1 %v2083_v60  ;;  %v1476_v60 = vld [vmem:[%s3052_s5 + $0x68] sm:$0xff] }
  0x80   : > { %1257 = vmatpush.bf16.msrb.mxu2 %v2091_v61  ;;  %v1475_v61 = vld [vmem:[%s3052_s5 + $0x60] sm:$0xff] }
  0x81   : > { %1356 = vmatpush.bf16.msra.mxu0 %v2103_v13  ;;  %1440 = vmatpush.bf16.msra.mxu3 %v2110_v34 }
  0x83   : > { %1245 = vmatpush.bf16.msrb.mxu1 %v2082_v63  ;;  %v1473_v63 = vld [vmem:[%s3052_s5 + $0x50] sm:$0xff] }
  0x84   : > { %1258 = vmatpush.bf16.msrb.mxu2 %v2090_v0  ;;  %v1472_v0 = vld [vmem:[%s3052_s5 + $0x48] sm:$0xff] }
  0x85   : > { %1357 = vmatpush.bf16.msra.mxu0 %v2102_v14  ;;  %1441 = vmatpush.bf16.msra.mxu3 %v2109_v37  ;;  %v1511_v37 = vld [vmem:[#allocation16] sm:$0xff] }
  0x87   : > { %1246 = vmatpush.bf16.msrb.mxu1 %v2081_v4  ;;  %v1468_v4 = vld [vmem:[%s3052_s5 + $0x28] sm:$0xff] }
  0x88   : > { %1259 = vmatpush.bf16.msrb.mxu2 %v2089_v5  ;;  %v1467_v5 = vld [vmem:[%s3052_s5 + $0x20] sm:$0xff] }
  0x89   : > { %1358 = vmatpush.bf16.msra.mxu0 %v2101_v16  ;;  %1442 = vmatpush.bf16.msra.mxu3 %v2108_v49 }
  0x8a   : > { %1247 = vmatmul.bf16.vlgmr.msrb.gmra.mxu1 %v880_v6  ;;  %v1466_v6 = vld [vmem:[%s3052_s5 + $0x18] sm:$0xff] }
  0x8b   : > { %1260 = vmatmul.bf16.vlgmr.msrb.gmra.mxu2 %v881_v7  ;;  %1480 = vmatpush.msra.mxu1 %v1478_v51  ;;  %v1465_v7 = vld [vmem:[%s3052_s5 + $0x10] sm:$0xff] }
  0x8c   : > { %1532 = vmatpush.msra.mxu2 %v1518_v24 }
  0x8d   : > { %1359 = vmatpush.bf16.msra.mxu0 %v2100_v17  ;;  %1443 = vmatpush.bf16.msra.mxu3 %v2107_v50 }
  0x8e   : > { %1481 = vmatpush.msra.mxu1 %v1477_v52  ;;  %1533 = vmatpush.msra.mxu2 %v1517_v25 }
  0x90   : > { %1482 = vmatpush.msra.mxu1 %v1476_v60 }
  0x91   : > { %1360 = vmatpush.bf16.msra.mxu0 %v2099_v21 }
  0x92   : > { %1483 = vmatpush.msra.mxu1 %v1475_v61 }
  0x94   : > { %1484 = vmatpush.msra.mxu1 %v1474_v62 }
  0x96   : > { %1485 = vmatpush.msra.mxu1 %v1473_v63 }
  0x98   : > { %1486 = vmatpush.msra.mxu1 %v1472_v0 }
  0x9a   : > { %1487 = vmatpush.msra.mxu1 %v1471_v1 }
  0x9c   : > { %1488 = vmatpush.msra.mxu1 %v1470_v2 }
  0x9e   : > { %1489 = vmatpush.msra.mxu1 %v1469_v3 }
  0xa0   : > { %1490 = vmatpush.msra.mxu1 %v1468_v4 }
  0xa2   : > { %1491 = vmatpush.msra.mxu1 %v1467_v5 }
  0xa4   : > { %1492 = vmatpush.msra.mxu1 %v1466_v6 }
  0xa6   : > { %1493 = vmatpush.msra.mxu1 %v1465_v7 }
  0xa8   : > { %1494 = vmatpush.msra.mxu1 %v1464_v8 }
  0xd3   : > { %v861_v9 = vpop.f32.mrf.mxu0 }
  0xdb   : > { %v863_v12 = vpop.f32.mrf.mxu0 }
  0xe7   : > { %v1196_v15 = vpop.f32.mrf.mxu1 }
  0xe8   : > { %v1197_v28 = vadd.f32 %v1196_v15, %v861_v9  ;;  %v1463_v9 = vld [vmem:[%s3052_s5] sm:$0xff] }
  0xe9   : > { %1495 = vmatpush.msra.mxu1 %v1463_v9 }
  0xee   : > { %v1209_v18 = vpop.f32.mrf.mxu2 }
  0xef   : > { %v1198_v19 = vpop.f32.mrf.mxu1  ;;  %v1222_v20 = vpop.f32.mrf.mxu3  ;;  %v1210_v30 = vadd.f32 %v1209_v18, %v1197_v28  ;;  %v1514_v28 = vld [vmem:[#allocation16 + $0x18] sm:$0xff] }
  0xf0   : > { %v1449_v19 = vld [vmem:[#allocation2] sm:$0x1] }
  0xf1   : > { %v1235_v22 = vpop.f32.mrf.mxu0  ;;  %v1223_v33 = vadd.f32 %v1222_v20, %v1210_v30  ;;  %v1479_v30 = vld [vmem:[#allocation14] sm:$0x1] }
  0xf3   : > { %v1236_v36 = vadd.f32 %v1235_v22, %v1223_v33 }
  0xf6   : > { %v1211_v23 = vpop.f32.mrf.mxu2 }
  0xf7   : > { %v1224_v26 = vpop.f32.mrf.mxu3 }
  0xf8   : > { %v1516_v26 = vld [vmem:[#allocation16 + $0x28] sm:$0xff] }
  0xf9   : > { %v1237_v27 = vpop.f32.mrf.mxu0  ;;  %1534 = vmatpush.msra.mxu2 %v1516_v26 }
  0xfa   : > { %v1515_v27 = vld [vmem:[#allocation16 + $0x20] sm:$0xff] }
  0xfb   : > { %1535 = vmatpush.msra.mxu2 %v1515_v27 }
  0xfd   : > { %1536 = vmatpush.msra.mxu2 %v1514_v28 }
  0xff   : > { %v1274_v32 = vpop.f32.mrf.mxu3  ;;  %1537 = vmatpush.msra.mxu2 %v1513_v29 }
 0x107   : > { %v1248_v35 = vpop.f32.mrf.mxu1  ;;  %v1276_v38 = vpop.f32.mrf.mxu3 }
 0x108   : > { %v1249_v39 = vadd.f32 %v1248_v35, %v1236_v36  ;;  %v1512_v36 = vld [vmem:[#allocation16 + $0x8] sm:$0xff]  ;;  %v1501_v38 = vld [vmem:[%s2869_s6] sm:$0x1] }
 0x109   : > { %1538 = vmatpush.msra.mxu2 %v1512_v36 }
 0x10b   : > { %1539 = vmatpush.msra.mxu2 %v1511_v37 }
 0x10e   : > { %v1261_v40 = vpop.f32.mrf.mxu2 }
 0x10f   : > { %v1262_v41 = vadd.f32 %v1261_v40, %v1249_v39  ;;  %v1250_v43 = vpop.f32.mrf.mxu1 }
 0x111   : > { %v1275_v44 = vadd.f32 %v1274_v32, %v1262_v41 }
 0x113   : > { %v1282_v45 = vadd.f32 %v2268_v42, %v1275_v44  ;;  %v1519_v42 = vld [vmem:[#allocation17] sm:$0x1] }
 0x115   : > { %v1283_v46 = vmax.f32 %v1282_v45, 0.0 }
 0x116   : > { %v1263_v47 = vpop.f32.mrf.mxu2 }
 0x117   : > { %v1284_v48 = vpack.c.bf16 %v1283_v46, %v1283_v46 }
 0x119   : > { %1361 = vmatmul.bf16.vlgmr.msra.gmra.mxu0 %v1284_v48 }
 0x196   : > { %v1362_v55 = vpop.f32.mrf.mxu0 }
 0x197   : > { %v1363_v56 = vadd.f32 %v2269_v54, %v1362_v55 }
 0x199   : > { %v1366_v57 = vmax.f32 %v1363_v56, 0.0 }
 0x19b   : > { %v1367_v58 = vpack.c.bf16 %v1366_v57, %v1366_v57 }
 0x19d   : > { %1444 = vmatmul.bf16.vlgmr.msra.gmra.mxu3 %v1367_v58 }
 0x19e   : > { %v1364_v59 = vpop.f32.mrf.mxu0 }
 0x220   : > { %v1445_v11 = vpop.f32.mrf.mxu3 }
 0x221   : > { %v1446_v12 = vadd.f32 %v2270_v10, %v1445_v11 }
 0x223   : > { %v1450_v13 = vrot.slane %v1446_v12, 4 }
 0x225   : > { %v1451_v14 = vadd.f32 %v1450_v13, %v1446_v12 }
 0x227   : > { %v1452_v15 = vrot.slane %v1451_v14, 2 }
 0x228   : > { %v1447_v16 = vpop.f32.mrf.mxu3 }
 0x229   : > { %v1453_v17 = vadd.f32 %v1452_v15, %v1451_v14 }
 0x22b   : > { %v1454_v18 = vrot.slane %v1453_v17, 1 }
 0x22d   : > { %v1455_v20 = vadd.f32 %v1454_v18, %v1453_v17 }
 0x22f   : > { %v1456_v21 = vadd.f32 %v1455_v20, %v1449_v19 }
 0x231   : > { %1457 = vst [vmem:[#allocation2] sm:$0x1] %v1456_v21 }
 0x238   : > { %v1461_v22 = vld [vmem:[#allocation2] sm:$0x1] }
 0x239   : > { %v1462_v23 = vmul.f32 0.125, %v1461_v22 }
 0x23b   : > { %1496 = vmatmul.f32.vlgmr.msra.gmra.mxu1 %v1462_v23 }
 0x2b8   : > { %v1497_v31 = vpop.f32.mrf.mxu1 }
 0x2b9   : > { %v1498_v32 = vadd.f32 %v1497_v31, %v1479_v30 }
 0x2bb   : > { %1500 = vst [vmem:[%s724_s15] sm:$0x1] %v1498_v32  ;;  %v1502_v33 = vmul.f32 0.5, %v1498_v32 }
 0x2bd   : > { %v1503_v34 = vmul.f32 1.442695, %v1502_v33 }
 0x2bf   : > { %2271 = vpow2.f32 %v1503_v34 }
 0x2c5   : > { %v2272_v35 = vpop.eup %2271 }
 0x2c6   : > { %1506 = vrot.lane.b32.xlu0 %v2272_v35, %s2659_s24 }
 0x338   : > { %v1507_v39 = vpop.permute.xlu0 %1506 }
 0x339   : > { %v1509_v40 = vmul.f32 %v1507_v39, %v1501_v38 }
 0x33b   : > { %v1510_v41 = vadd.f32 %v1509_v40, %v1498_v32 }
 0x33d   : > { %2046 = vmatmul.msk.f32.vlgmr.msra.gmra.mxu2 %vm1520_vm3, %v1510_v41 }
 0x3c0   : > { %v1541_v43 = vpop.f32.mrf.mxu2 }
 0x3c1   : > { %v1542_v44 = vadd.f32 %v1541_v43, %v1519_v42 }
 0x3c3   : > { %1544 = vst [vmem:[%s727_s25] sm:$0x1] %v1542_v44 }
 0x3c4 PF: > { %s34_s23 = sadd.s32 1, %s2643_s23   ;;  %s3055_s18 = smov %s2627_s19 }
 0x3c5   : > { %p31_p1 = scmp.ge.s32.totalorder %s34_s23, 4   ;;  %s3056_s19 = smov %s2631_s20 }
 0x3c6   : > { %s3057_s20 = smov %s2862_s16  ;;  %s3058_s21 = smov %s2639_s22 }
 0x3c7   : > { %s3059_s22 = smov %s3061_s10  ;;  %33 = sbr.rel (!%p31_p1) target bundleno = 18 (0x12), region = 178 }
 0x3cc   :  { %1574 = vsyncpa [#allocation4], 1 }
 0x3cd   :  { %1576 = vsyncpa [#allocation4 + $0x1], 1 }
 0x3ce   :  { %1577 = vsyncpa [#allocation6], 1 }
 0x3cf   :  { %1578 = vsyncpa [#allocation9], 1 }
 0x3d0   :  { %1579 = vsyncpa [#allocation12], 1 }
 0x3d1   :  { %1580 = vsyncpa [#allocation15], 1 }
 0x3d2   :  { %1581 = vsyncpa [#allocation18], 1 }

// kernel: neural_process_forward.3
= control target key start
LH: loop header
LB: loop body
LE: loop exit
PB: predicated region body
PF: predicated region fallthrough
CT: control target
= control target key end

     0   :  { %12 = vsyncpa [#allocation3], 0  ;;  %s1941_s0 = inlined_call_operand.vmem [shape: f32[2,1,128], index: 0, kind: input, shape index: {}]   ;;  %s1942_s1 = inlined_call_operand.vmem [shape: bf16[2,8,784], index: 1, kind: input, shape index: {}]   ;;  %s1943_s2 = inlined_call_operand.vmem [shape: bf16[784,128], index: 2, kind: input, shape index: {}]   ;;  %s1944_s3 = inlined_call_operand.vmem [shape: bf16[128,128], index: 3, kind: input, shape index: {}]   ;;  %s1945_s4 = inlined_call_operand.vmem [shape: f32[1,128], index: 4, kind: input, shape index: {}]   ;;  %s1946_s5 = inlined_call_operand.vmem [shape: bf16[128,128], index: 5, kind: input, shape index: {}]   ;;  %s1947_s6 = inlined_call_operand.vmem [shape: f32[1,128], index: 6, kind: input, shape index: {}]   ;;  %s1948_s7 = inlined_call_operand.hbm [shape: f32[2,8,128], index: 7, kind: output, shape index: {}]  }
   0x1   :  { %14 = vsyncpa [#allocation3 + $0x1], 0  ;;  %s1625_s24 = smov 0   ;;  %s1627_s25 = smov 0  }
   0x2   :  { %s1629_s26 = smov 0   ;;  %s1631_s27 = smov 0  }
   0x3   :  { %s1633_s28 = smov 0   ;;  %s1635_s29 = smov 0  }
   0x4 LB: > { %s1109_s30 = sadd.s32 4294967295, %s1583_s29   ;;  %s1110_s8 = sadd.s32 4294967294, %s1583_s29   ;;  %s1583_s29 = sphi %s1635_s29, %s20_s29   ;;  %s1579_s28 = sphi %s1633_s28, %s1956_s28   ;;  %s1575_s27 = sphi %s1631_s27, %s1955_s27   ;;  %s1571_s26 = sphi %s1629_s26, %s1954_s26   ;;  %s1567_s25 = sphi %s1627_s25, %s1953_s25   ;;  %s1563_s24 = sphi %s1625_s24, %s1952_s24  }
   0x5   : > { %s29_s9 = sadd.s32 1, %s1579_s28  ;;  %s200_s10 = sadd.s32 1, %s1571_s26 }
   0x6   : > { %p30_p0 = scmp.ge.s32.totalorder %s29_s9, 2  ;;  %p210_p1 = scmp.ne.s32.totalorder %s1571_s26, %s1567_s25 }
   0x7   : > { %p211_p2 = scmp.eq.s32.totalorder %s1109_s30, 1  ;;  %p216_p3 = scmp.ne.s32.totalorder %s1567_s25, %s1563_s24 }
   0x8   : > { %s1958_s9 = smov (%p30_p0, %s29_s9), 0  ;;  %p217_p5 = scmp.eq.s32.totalorder %s1110_s8, 1 }
   0x9   : > { %p1665_p4 = por %p211_p2, %p210_p1  ;;  %s195_s12 = ssub.s32 %s1579_s28, %s1958_s9 }
   0xa   : > { %p1113_p6 = scmp.ge.s32.totalorder %s1583_s29, 1  ;;  %p198_p7 = scmp.eq.s32.totalorder %s195_s12, 0 }
   0xb   : > { %p1672_p8 = por %p217_p5, %p216_p3  ;;  %p268_p9 = scmp.lt.s32.totalorder %s1583_s29, 3 }
   0xc   : > { %s1678_s14 = scalar_select %p198_p7, %s1571_s26, %s200_s10  }
   0xd   : > { %p269_p10 = pnand %p1113_p6, %p268_p9 }
   0xe   : > { %p307_p11 = scmp.lt.s32.totalorder (!%p269_p10), %s1575_s27, 1  ;;  %s1525_s18 = scalar_lea.hbm (!%p269_p10), %s1948_s7, 16 }
   0xf   : > { %272 = sbr.rel (%p269_p10) target bundleno = 498 (0x1f2), region = 48 }
  0x14   : > { %v1388_v0 = vld [vmem:[%s1943_s2 + $0x38] sm:$0xff]  ;;  %v1387_v3 = vld [vmem:[%s1943_s2 + $0x30] sm:$0xff]  ;;  %v1386_v8 = vld [vmem:[%s1943_s2 + $0x28] sm:$0xff]  ;;  %s1727_s19 = scalar_select %p307_p11, %s1575_s27, 1  ;;  %vm744_vm0 = vcmask 130048  }
  0x15   : > { %v1396_v1 = vld [vmem:[%s1943_s2 + $0x78] sm:$0xff]  ;;  %748 = vmatpush.bf16.msra.mxu0 %v1388_v0  ;;  %v1395_v4 = vld [vmem:[%s1943_s2 + $0x70] sm:$0xff]  ;;  %v1394_v9 = vld [vmem:[%s1943_s2 + $0x68] sm:$0xff] }
  0x16   : > { %v1404_v2 = vld [vmem:[%s1943_s2 + $0xb8] sm:$0xff]  ;;  %761 = vmatpush.bf16.msra.mxu1 %v1396_v1  ;;  %v1403_v5 = vld [vmem:[%s1943_s2 + $0xb0] sm:$0xff]  ;;  %v1402_v10 = vld [vmem:[%s1943_s2 + $0xa8] sm:$0xff]  ;;  %s1446_s21 = smul.u32 28, %s1727_s19  ;;  %s1951_s10 = scalar_lea.vmem %s1941_s0, %s1727_s19 }
  0x17   : > { %774 = vmatpush.bf16.msra.mxu2 %v1404_v2  ;;  %v1412_v6 = vld [vmem:[%s1943_s2 + $0xf8] sm:$0xff]  ;;  %v1411_v7 = vld [vmem:[%s1943_s2 + $0xf0] sm:$0xff]  ;;  %v1410_v11 = vld [vmem:[%s1943_s2 + $0xe8] sm:$0xff] }
  0x18   : > { %787 = vmatpush.bf16.msra.mxu3 %v1412_v6  ;;  %v1385_v12 = vld [vmem:[%s1943_s2 + $0x20] sm:$0xff]  ;;  %v1384_v16 = vld [vmem:[%s1943_s2 + $0x18] sm:$0xff]  ;;  %v1383_v20 = vld [vmem:[%s1943_s2 + $0x10] sm:$0xff]  ;;  %s1764_s15 = scalar_lea.vmem %s1942_s1, %s1446_s21  ;;  %s1378_s21 = sshll.u32 %s1575_s27, 3 }
  0x19   : > { %749 = vmatpush.bf16.msra.mxu0 %v1387_v3  ;;  %v1393_v13 = vld [vmem:[%s1943_s2 + $0x60] sm:$0xff]  ;;  %v1392_v17 = vld [vmem:[%s1943_s2 + $0x58] sm:$0xff]  ;;  %v1391_v21 = vld [vmem:[%s1943_s2 + $0x50] sm:$0xff]  ;;  %s1018_s19 = scalar_lea.hbm %s1948_s7, %s1378_s21 }
  0x1a   : > { %762 = vmatpush.bf16.msra.mxu1 %v1395_v4  ;;  %v1401_v14 = vld [vmem:[%s1943_s2 + $0xa0] sm:$0xff]  ;;  %v1400_v18 = vld [vmem:[%s1943_s2 + $0x98] sm:$0xff]  ;;  %v1399_v22 = vld [vmem:[%s1943_s2 + $0x90] sm:$0xff]  ;;  %s1022_s8 = sshll.u32 %s1018_s19, 4  ;;  %s1023_s8 = int_to_ptr.hbm [resolvable:$true] %s1022_s8 }
  0x1b   : > { %775 = vmatpush.bf16.msra.mxu2 %v1403_v5  ;;  %v1409_v15 = vld [vmem:[%s1943_s2 + $0xe0] sm:$0xff]  ;;  %v1408_v19 = vld [vmem:[%s1943_s2 + $0xd8] sm:$0xff]  ;;  %v1407_v23 = vld [vmem:[%s1943_s2 + $0xd0] sm:$0xff]  ;;  %s1519_s27 = sshra.s32 %s1023_s8, 4  ;;  %s1520_s27 = int_to_ptr.hbm [resolvable:$true] %s1519_s27 }
  0x1c   : > { %788 = vmatpush.bf16.msra.mxu3 %v1411_v7  ;;  %v1382_v24 = vld [vmem:[%s1943_s2 + $0x8] sm:$0xff]  ;;  %v320_v26 = vld [vmem:[%s1764_s15] sm:$0xff]  ;;  %v1420_v34 = vld [vmem:[%s1943_s2 + $0x138] sm:$0xff]  ;;  %s1521_s12 = scalar_lea.hbm %s1520_s27, 8  ;;  %p1526_p1 = scmp.lt.s32.totalorder %s1520_s27, %s1948_s7 }
  0x1d   : > { %750 = vmatpush.bf16.msra.mxu0 %v1386_v8  ;;  %v1390_v25 = vld [vmem:[%s1943_s2 + $0x48] sm:$0xff]  ;;  %v430_v29 = vunpack.c.l.b16 %v320_v26  ;;  %v431_v31 = vunpack.c.h.b16 %v320_v26  ;;  %v1381_v32 = vld [vmem:[%s1943_s2] sm:$0xff]  ;;  %v1428_v35 = vld [vmem:[%s1943_s2 + $0x178] sm:$0xff]  ;;  %p1522_p12 = scmp.ne.s32.totalorder %s1520_s27, %s1521_s12  ;;  %p1527_p2 = scmp.lt.s32.totalorder %s1525_s18, %s1521_s12 }
  0x1e   : > { %763 = vmatpush.bf16.msra.mxu1 %v1394_v9  ;;  %v1398_v27 = vld [vmem:[%s1943_s2 + $0x88] sm:$0xff]  ;;  %v1389_v33 = vld [vmem:[%s1943_s2 + $0x40] sm:$0xff]  ;;  %v1419_v43 = vld [vmem:[%s1943_s2 + $0x130] sm:$0xff] }
  0x1f   : > { %776 = vmatpush.bf16.msra.mxu2 %v1402_v10  ;;  %v321_v28 = vld [vmem:[%s1764_s15 + $0x8] sm:$0xff]  ;;  %v1397_v36 = vld [vmem:[%s1943_s2 + $0x80] sm:$0xff]  ;;  %v437_v38 = vpack.c.b16 %v430_v29, %v430_v29  ;;  %v438_v39 = vpack.c.b16 %v431_v31, %v431_v31  ;;  %v1427_v44 = vld [vmem:[%s1943_s2 + $0x170] sm:$0xff]  ;;  %p1523_p13 = pnand %p1522_p12, %p1665_p4  ;;  %p1528_p3 = por %p1527_p2, %p1526_p1 }
  0x20   : > { %789 = vmatpush.bf16.msra.mxu3 %v1410_v11  ;;  %v1406_v30 = vld [vmem:[%s1943_s2 + $0xc8] sm:$0xff]  ;;  %v432_v37 = vunpack.c.l.b16 %v321_v28  ;;  %v433_v40 = vunpack.c.h.b16 %v321_v28  ;;  %v1405_v41 = vld [vmem:[%s1943_s2 + $0xc0] sm:$0xff]  ;;  %v323_v51 = vld [vmem:[%s1764_s15 + $0x18] sm:$0xf] }
  0x21   : > { %751 = vmatpush.bf16.msra.mxu0 %v1385_v12  ;;  %v1429_v42 = vld [vmem:[%s1943_s2 + $0x180] sm:$0xff]  ;;  %v1418_v47 = vld [vmem:[%s1943_s2 + $0x128] sm:$0xff]  ;;  %v1416_v52 = vld [vmem:[%s1943_s2 + $0x118] sm:$0xff]  ;;  %v436_v54 = vunpack.c.l.b16 %v323_v51  ;;  %p1524_p0 = pneg %p1523_p13 }
  0x22   : > { %764 = vmatpush.bf16.msra.mxu1 %v1393_v13  ;;  %v439_v45 = vpack.c.b16 %v432_v37, %v432_v37  ;;  %v440_v46 = vpack.c.b16 %v433_v40, %v433_v40  ;;  %v1426_v48 = vld [vmem:[%s1943_s2 + $0x168] sm:$0xff]  ;;  %v1417_v49 = vld [vmem:[%s1943_s2 + $0x120] sm:$0xff]  ;;  %v1424_v53 = vld [vmem:[%s1943_s2 + $0x158] sm:$0xff] }
  0x23   : > { %777 = vmatpush.bf16.msra.mxu2 %v1401_v14  ;;  %v1425_v50 = vld [vmem:[%s1943_s2 + $0x160] sm:$0xff]  ;;  %v1415_v55 = vld [vmem:[%s1943_s2 + $0x110] sm:$0xff]  ;;  %v443_v57 = vpack.c.b16 %v436_v54, %v436_v54  ;;  %v1414_v58 = vld [vmem:[%s1943_s2 + $0x108] sm:$0xff]  ;;  %p1529_p5 = pnand %p1528_p3, %p1524_p0 }
  0x24   : > { %790 = vmatpush.bf16.msra.mxu3 %v1409_v15  ;;  %v1423_v56 = vld [vmem:[%s1943_s2 + $0x150] sm:$0xff]  ;;  %v1422_v59 = vld [vmem:[%s1943_s2 + $0x148] sm:$0xff]  ;;  %v1413_v63 = vld [vmem:[%s1943_s2 + $0x100] sm:$0xff] }
  0x25   : > { %752 = vmatpush.bf16.msra.mxu0 %v1384_v16  ;;  %v322_v60 = vld [vmem:[%s1764_s15 + $0x10] sm:$0xff]  ;;  %v1421_v0 = vld [vmem:[%s1943_s2 + $0x140] sm:$0xff]  ;;  %v1437_v3 = vld [vmem:[%s1944_s3 + $0x38] sm:$0xff]  ;;  %s304_s15 = sand.u32 1, %s1567_s25  }
  0x26   : > { %765 = vmatpush.bf16.msra.mxu1 %v1392_v17  ;;  %v434_v61 = vunpack.c.l.b16 %v322_v60  ;;  %v435_v62 = vunpack.c.h.b16 %v322_v60  ;;  %v1436_v4 = vld [vmem:[%s1944_s3 + $0x30] sm:$0xff]  ;;  %v1435_v5 = vld [vmem:[%s1944_s3 + $0x28] sm:$0xff]  ;;  %v1434_v6 = vld [vmem:[%s1944_s3 + $0x20] sm:$0xff]  ;;  %s1114_s16 = sshll.u32 %s304_s15, 3 }
  0x27   : > { %778 = vmatpush.bf16.msra.mxu2 %v1400_v18  ;;  %v1433_v7 = vld [vmem:[%s1944_s3 + $0x18] sm:$0xff]  ;;  %v1432_v8 = vld [vmem:[%s1944_s3 + $0x10] sm:$0xff]  ;;  %v1431_v9 = vld [vmem:[%s1944_s3 + $0x8] sm:$0xff]  ;;  %s306_s23 = scalar_lea.vmem [#allocation2], %s1114_s16 }
  0x28   : > { %791 = vmatpush.bf16.msra.mxu3 %v1408_v19  ;;  %v441_v1 = vpack.c.b16 %v434_v61, %v434_v61  ;;  %v442_v2 = vpack.c.b16 %v435_v62, %v435_v62  ;;  %v1430_v12 = vld [vmem:[%s1944_s3] sm:$0xff]  ;;  %v1445_v15 = vld [vmem:[%s1946_s5 + $0x38] sm:$0xff]  ;;  %v1444_v18 = vld [vmem:[%s1946_s5 + $0x30] sm:$0xff]  ;;  %s1020_s30 = sshll.u32 %s306_s23, 4  ;;  %s1021_s30 = int_to_ptr.vmem [resolvable:$true] %s1020_s30 }
  0x29   : > { %753 = vmatpush.bf16.msra.mxu0 %v1383_v20  ;;  %v1502_v19 = vld [vmem:[%s1951_s10] ss:$0 sm:$0xff]  ;;  %v1443_v20 = vld [vmem:[%s1946_s5 + $0x28] sm:$0xff]  ;;  %v1441_v26 = vld [vmem:[%s1946_s5 + $0x18] sm:$0xff]  ;;  %s1007_s10 = scalar_lea.sflag [#allocation3], %s304_s15 }
  0x2a   : > { %766 = vmatpush.bf16.msra.mxu1 %v1391_v21  ;;  %v1440_v29 = vld [vmem:[%s1946_s5 + $0x10] sm:$0xff] }
  0x2b   : > { %779 = vmatpush.bf16.msra.mxu2 %v1399_v22 }
  0x2c   : > { %792 = vmatpush.bf16.msra.mxu3 %v1407_v23 }
  0x2d   : > { %754 = vmatpush.bf16.msra.mxu0 %v1382_v24  ;;  %v1442_v24 = vld [vmem:[%s1946_s5 + $0x20] sm:$0xff] }
  0x2e   : > { %767 = vmatpush.bf16.msra.mxu1 %v1390_v25 }
  0x2f   : > { %780 = vmatpush.bf16.msra.mxu2 %v1398_v27 }
  0x30   : > { %793 = vmatpush.bf16.msra.mxu3 %v1406_v30 }
  0x31   : > { %755 = vmatpush.bf16.msra.mxu0 %v1381_v32 }
  0x32   : > { %768 = vmatpush.bf16.msra.mxu1 %v1389_v33 }
  0x33   : > { %781 = vmatpush.bf16.msra.mxu2 %v1397_v36 }
  0x34   : > { %756 = vmatmul.bf16.vlgmr.msra.gmra.mxu0 %v437_v38  ;;  %794 = vmatpush.bf16.msra.mxu3 %v1405_v41  ;;  %v1439_v41 = vld [vmem:[%s1946_s5 + $0x8] sm:$0xff] }
  0x35   : > { %800 = vmatpush.bf16.msrb.mxu0 %v1420_v34  ;;  %769 = vmatmul.bf16.vlgmr.msra.gmra.mxu1 %v438_v39 }
  0x36   : > { %813 = vmatpush.bf16.msrb.mxu1 %v1428_v35  ;;  %782 = vmatmul.bf16.vlgmr.msra.gmra.mxu2 %v439_v45 }
  0x37   : > { %833 = vmatpush.bf16.msrb.mxu2 %v1429_v42  ;;  %795 = vmatmul.bf16.vlgmr.msra.gmra.mxu3 %v440_v46  ;;  %v1438_v42 = vld [vmem:[%s1946_s5] sm:$0xff] }
  0x38   : > { %909 = vmatpush.bf16.msrb.mxu3 %v1437_v3 }
  0x39   : > { %801 = vmatpush.bf16.msrb.mxu0 %v1419_v43  ;;  %v1503_v43 = vld [vmem:[%s1945_s4] ss:$0 sm:$0xff] }
  0x3a   : > { %814 = vmatpush.bf16.msrb.mxu1 %v1427_v44 }
  0x3b   : > { %992 = vmatpush.bf16.msra.mxu2 %v1445_v15 }
  0x3c   : > { %910 = vmatpush.bf16.msrb.mxu3 %v1436_v4 }
  0x3d   : > { %802 = vmatpush.bf16.msrb.mxu0 %v1418_v47 }
  0x3e   : > { %815 = vmatpush.bf16.msrb.mxu1 %v1426_v48 }
  0x3f   : > { %993 = vmatpush.bf16.msra.mxu2 %v1444_v18 }
  0x40   : > { %911 = vmatpush.bf16.msrb.mxu3 %v1435_v5 }
  0x41   : > { %803 = vmatpush.bf16.msrb.mxu0 %v1417_v49  ;;  %v1504_v49 = vld [vmem:[%s1947_s6] ss:$0 sm:$0xff] }
  0x42   : > { %816 = vmatpush.bf16.msrb.mxu1 %v1425_v50 }
  0x43   : > { %994 = vmatpush.bf16.msra.mxu2 %v1443_v20 }
  0x44   : > { %912 = vmatpush.bf16.msrb.mxu3 %v1434_v6 }
  0x45   : > { %804 = vmatpush.bf16.msrb.mxu0 %v1416_v52 }
  0x46   : > { %817 = vmatpush.bf16.msrb.mxu1 %v1424_v53  ;;  %1312 = vmatmul.msk.bf16.vlgmr.msrb.gmra.mxu2 %vm744_vm0, %v443_v57 }
  0x47   : > { %995 = vmatpush.bf16.msra.mxu2 %v1442_v24 }
  0x48   : > { %913 = vmatpush.bf16.msrb.mxu3 %v1433_v7 }
  0x49   : > { %805 = vmatpush.bf16.msrb.mxu0 %v1415_v55 }
  0x4a   : > { %818 = vmatpush.bf16.msrb.mxu1 %v1423_v56 }
  0x4b   : > { %996 = vmatpush.bf16.msra.mxu2 %v1441_v26 }
  0x4c   : > { %914 = vmatpush.bf16.msrb.mxu3 %v1432_v8 }
  0x4d   : > { %806 = vmatpush.bf16.msrb.mxu0 %v1414_v58 }
  0x4e   : > { %819 = vmatpush.bf16.msrb.mxu1 %v1422_v59 }
  0x4f   : > { %997 = vmatpush.bf16.msra.mxu2 %v1440_v29 }
  0x50   : > { %915 = vmatpush.bf16.msrb.mxu3 %v1431_v9 }
  0x51   : > { %807 = vmatpush.bf16.msrb.mxu0 %v1413_v63 }
  0x52   : > { %820 = vmatpush.bf16.msrb.mxu1 %v1421_v0 }
  0x53   : > { %998 = vmatpush.bf16.msra.mxu2 %v1439_v41 }
  0x54   : > { %808 = vmatmul.bf16.vlgmr.msrb.gmra.mxu0 %v441_v1  ;;  %916 = vmatpush.bf16.msrb.mxu3 %v1430_v12 }
  0x55   : > { %821 = vmatmul.bf16.vlgmr.msrb.gmra.mxu1 %v442_v2 }
  0x57   : > { %999 = vmatpush.bf16.msra.mxu2 %v1438_v42 }
  0xb1   : > { %v757_v10 = vpop.f32.mrf.mxu0 }
  0xb2   : > { %v770_v11 = vpop.f32.mrf.mxu1  ;;  %v758_v21 = vadd.f32 %v1502_v19, %v757_v10 }
  0xb4   : > { %v771_v25 = vadd.f32 %v770_v11, %v758_v21 }
  0xb9   : > { %v759_v13 = vpop.f32.mrf.mxu0  ;;  %v783_v16 = vpop.f32.mrf.mxu2 }
  0xba   : > { %v772_v14 = vpop.f32.mrf.mxu1  ;;  %v796_v17 = vpop.f32.mrf.mxu3  ;;  %v784_v27 = vadd.f32 %v783_v16, %v771_v25 }
  0xbc   : > { %v797_v30 = vadd.f32 %v796_v17, %v784_v27 }
  0xc1   : > { %v785_v22 = vpop.f32.mrf.mxu2 }
  0xc2   : > { %v798_v23 = vpop.f32.mrf.mxu3 }
  0xc9   : > { %v835_v28 = vpop.f32.mrf.mxu2 }
  0xd1   : > { %v809_v31 = vpop.f32.mrf.mxu0  ;;  %v837_v35 = vpop.f32.mrf.mxu2 }
  0xd2   : > { %v822_v32 = vpop.f32.mrf.mxu1  ;;  %v810_v33 = vadd.f32 %v809_v31, %v797_v30 }
  0xd4   : > { %v823_v34 = vadd.f32 %v822_v32, %v810_v33 }
  0xd6   : > { %v836_v36 = vadd.f32 %v835_v28, %v823_v34 }
  0xd8   : > { %v839_v37 = vmax.f32 %v836_v36, 0.0 }
  0xd9   : > { %v811_v38 = vpop.f32.mrf.mxu0 }
  0xda   : > { %v824_v39 = vpop.f32.mrf.mxu1  ;;  %v840_v40 = vpack.c.bf16 %v839_v37, %v839_v37 }
  0xdc   : > { %917 = vmatmul.bf16.vlgmr.msrb.gmra.mxu3 %v840_v40 }
 0x15f   : > { %v918_v44 = vpop.f32.mrf.mxu3 }
 0x160   : > { %v919_v45 = vadd.f32 %v1503_v43, %v918_v44 }
 0x162   : > { %v922_v46 = vmax.f32 %v919_v45, 0.0 }
 0x164   : > { %v923_v47 = vpack.c.bf16 %v922_v46, %v922_v46 }
 0x166   : > { %1000 = vmatmul.bf16.vlgmr.msra.gmra.mxu2 %v923_v47 }
 0x167   : > { %v920_v48 = vpop.f32.mrf.mxu3 }
 0x1e9   : > { %v1001_v50 = vpop.f32.mrf.mxu2 }
 0x1ea   : > { %v1002_v51 = vadd.f32 %v1504_v49, %v1001_v50 }
 0x1ec   : > { %1005 = vst [vmem:[%s306_s23] sm:$0xff] %v1002_v51 }
 0x1ed   : > { %1532 = shalt.err (!%p1529_p5)
}
 0x1ee   : > { %1447 = dma.vmem_to_hbm [thread:$0]  (%p1665_p4), %s1021_s30, 128, %s1023_s8, %s1007_s10  }
 0x1f1   : > { %v1003_v52 = vpop.f32.mrf.mxu2 }
 0x1f2 PF: > { %p1453_p6 = scmp.ge.s32.totalorder %s1583_s29, 2  ;;  %s1034_s15 = sand.u32 1, %s1563_s24  }
 0x1f3   : > { %s1035_s19 = scalar_lea.sflag [#allocation3], %s1034_s15 }
 0x1f4   : > { %p1450_p7 = pnand %p1453_p6, %p1672_p8 }
 0x1f6   : > { %p1451_p9 = pneg %p1450_p7 }
 0x1f8   : > { %1558 = dma.done.wait (%p1451_p9), %s1035_s19, 128  }
 0x1f9   : > { %1560 = vsyncadd (%p1451_p9), %s1035_s19, 4294967168  ;;  %s20_s29 = sadd.s32 1, %s1583_s29   ;;  %s1952_s24 = smov %s1567_s25 }
 0x1fa   : > { %p17_p10 = scmp.ge.s32.totalorder %s20_s29, 4   ;;  %s1953_s25 = smov %s1571_s26 }
 0x1fb   : > { %s1954_s26 = smov %s1678_s14  ;;  %s1955_s27 = smov %s1579_s28 }
 0x1fc   : > { %s1956_s28 = smov %s1958_s9  ;;  %19 = sbr.rel (!%p17_p10) target bundleno = 4 (0x4), region = 86 }
 0x201   :  { %1041 = vsyncpa [#allocation3], 1 }
 0x202   :  { %1043 = vsyncpa [#allocation3 + $0x1], 1 }

</bundles_post_ra>
